<compile_context>
chip_gen: v6e
topology: v6e:2x2x1
jax: 0.10.0
libtpu: 0.0.40
codegen_flags: <defaults>
</compile_context>

<pallas_src>
import functools

import jax
import jax.numpy as jnp
from jax.experimental import pallas as pl
from jax.experimental.pallas import tpu as pltpu


def predictor_kernel(xc_ref, xp_ref, xn_ref, convw_ref, convb_ref, g_ref,
                     beta_ref, linw_ref, linb_ref, o_ref, *,
                     num_layers, ksize, eps, seq_len, t_tile, halo):
    """One grid step = one (batch, T-tile) pair.

    The working slab is [top halo | tile | bottom halo] rows; halo >= L*pad so
    the conv receptive field of the stored central rows never leaves the slab.
    """
    pad = ksize // 2
    t = pl.program_id(1)
    t_work = t_tile + 2 * halo

    # Assemble the working slab (all pieces are 8-row aligned -> cheap concat).
    x = jnp.concatenate([xp_ref[0], xc_ref[0], xn_ref[0]], axis=0)
    x = x.astype(jnp.float32)                                  # (t_work, D)

    # Hoisted once (identical every layer): which slab rows are real sequence
    # positions.  Out-of-sequence rows are zeroed before *every* conv, which
    # (a) discards the clamped halo fetches at the sequence edges and
    # (b) reproduces PyTorch's "same" zero padding at those edges.
    row = jax.lax.broadcasted_iota(jnp.int32, (t_work, 1), 0)
    grow = row + (t * t_tile - halo)                           # global row idx
    valid = jnp.logical_and(grow >= 0, grow < seq_len)

    # Static per-tap time shifts: tap k reads row (t + k - pad) -> shift pad-k.
    tap_shift = [pad - k for k in range(ksize)]

    # TODO(synk): for num_layers > ~3 switch this unrolled loop to
    # lax.fori_loop with dynamic convw_ref[l] indexing to bound vreg live ranges.
    for l in range(num_layers):
        xpad = jnp.where(valid, x, 0.0)                        # "same"-pad zeros

        # Fused conv: build [x(t+0-pad) | x(t+1-pad) | x(t+2-pad)] once, then a
        # single (t_work, K*D) @ (K*D, D) MXU matmul (bf16 operands, f32 acc).
        # Rolls wrap garbage only into halo rows, which never reach the stored
        # central rows because halo >= num_layers * pad.
        parts = []
        for s in tap_shift:
            p = xpad if s == 0 else pltpu.roll(xpad, shift=s % t_work, axis=0)
            parts.append(p.astype(jnp.bfloat16))
        xk = jnp.concatenate(parts, axis=-1)                   # (t_work, K*D)
        y = jnp.dot(xk, convw_ref[l], preferred_element_type=jnp.float32)

        y = jnp.maximum(y + convb_ref[l], 0.0)                 # bias + ReLU

        # LayerNorm over channels, in f32.
        mean = jnp.mean(y, axis=-1, keepdims=True)
        var = jnp.mean(jnp.square(y - mean), axis=-1, keepdims=True)
        x = (y - mean) * jax.lax.rsqrt(var + eps) * g_ref[l] + beta_ref[l]
        # TODO(synk): nn.Dropout(p=0.5) is identity in eval mode; a training
        # path would need pltpu.prng_* and a stochastic mask.

    # Linear head on the central (stored) rows only.  Narrow (T_tile, C) store:
    # masked vst, but 16x fewer HBM writeback bytes than a 128-padded f32 slab.
    xc = x[halo:halo + t_tile].astype(jnp.bfloat16)            # 8-aligned slice
    out = jnp.dot(xc, linw_ref[...], preferred_element_type=jnp.float32)
    o_ref[0] = (out + linb_ref[...]).astype(o_ref.dtype)


def predictor_forward(x, conv_w, conv_b, ln_g, ln_b, lin_w, lin_b,
                      *, kernel_size=3, b_duration=False, eps=1e-5,
                      t_tile=None):
    """x: (B, T, D).  conv_w: (L, D_out, D_in, K) (PyTorch Conv1d layout).
    lin_w: (D, C) (already input-major), lin_b: (C,)."""
    B, T, D = x.shape
    L = conv_w.shape[0]
    K = kernel_size
    C = lin_w.shape[1]
    pad = K // 2

    # Halo rows per side of a T tile: enough for L stacked width-K convs,
    # rounded up to the 8-row sublane granule so halo blocks are aligned.
    halo = ((L * pad + 7) // 8) * 8

    # T-tile selection.  TODO(synk): re-derive the tile per generation for
    # production T/D (v7x has 64 MiB physical VMEM vs 128 MiB on v5e/v6e); the
    # f32 working set per step is ~5 * (t_tile + 2*halo) * D * 4 bytes.
    if t_tile is None:
        t_tile = T
        for cand in (1024, 512, 256, 128, 64, 32, 16, 8):
            if cand <= T and T % cand == 0 and cand % halo == 0:
                t_tile = cand
                break
    if T % t_tile != 0 or t_tile % halo != 0:
        raise ValueError(
            f"T={T} must be divisible by t_tile={t_tile}, and t_tile by the "
            f"{halo}-row halo granule (pad T or pick another tile).")
    nt = T // t_tile
    nh = t_tile // halo            # halo-sized blocks per tile (halo indexing)

    # Conv taps stacked along the contraction dim:
    #   (L, D_out, D_in, K) -> (L, K, D_in, D_out) -> (L, K*D_in, D_out), bf16.
    # One matmul per layer replaces K per-tap matmuls.
    w_stk = (jnp.transpose(conv_w, (0, 3, 2, 1))
             .reshape(L, K * D, D).astype(jnp.bfloat16))
    cb = conv_b.reshape(L, 1, D).astype(jnp.float32)
    g = ln_g.reshape(L, 1, D).astype(jnp.float32)
    be = ln_b.reshape(L, 1, D).astype(jnp.float32)
    lw = lin_w.astype(jnp.bfloat16)                            # (D, C)
    lb = lin_b.reshape(1, C).astype(jnp.float32)

    kernel = functools.partial(predictor_kernel, num_layers=L, ksize=K,
                               eps=eps, seq_len=T, t_tile=t_tile, halo=halo)

    def run(single_buffer_weights):
        def wspec(shape):
            imap = lambda b, t, _n=len(shape): (0,) * _n
            if single_buffer_weights:
                # Grid-invariant weights: no point double-buffering them.
                return pl.BlockSpec(shape, imap, pipeline_mode=pl.Buffered(1))
            return pl.BlockSpec(shape, imap)

        cur_spec = pl.BlockSpec((1, t_tile, D), lambda b, t: (b, t, 0))
        prev_spec = pl.BlockSpec(
            (1, halo, D), lambda b, t: (b, jnp.maximum(t * nh - 1, 0), 0))
        next_spec = pl.BlockSpec(
            (1, halo, D),
            lambda b, t: (b, jnp.minimum((t + 1) * nh, T // halo - 1), 0))

        return pl.pallas_call(
            kernel,
            out_shape=jax.ShapeDtypeStruct((B, T, C), x.dtype),
            grid_spec=pltpu.PrefetchScalarGridSpec(
                num_scalar_prefetch=0,
                grid=(B, nt),
                in_specs=[
                    cur_spec,                 # tile rows of x
                    prev_spec,                # halo rows above (clamped)
                    next_spec,                # halo rows below (clamped)
                    wspec((L, K * D, D)),     # stacked conv taps (bf16)
                    wspec((L, 1, D)),         # conv bias
                    wspec((L, 1, D)),         # LN gamma
                    wspec((L, 1, D)),         # LN beta
                    wspec((D, C)),            # linear W (bf16)
                    wspec((1, C)),            # linear b
                ],
                out_specs=pl.BlockSpec((1, t_tile, C), lambda b, t: (b, t, 0)),
            ),
            compiler_params=pltpu.CompilerParams(
                dimension_semantics=("parallel", "parallel"),
                vmem_limit_bytes=64 * 1024 * 1024),
        )(x, x, x, w_stk, cb, g, be, lw, lb)

    try:
        out = run(True)
    except Exception:
        # Fallback for jax versions without BlockSpec pipeline_mode support.
        out = run(False)

    if b_duration:
        out = jnp.squeeze(out, axis=-1)
    return out


def predictor_reference(x, conv_w, conv_b, ln_g, ln_b, lin_w, lin_b,
                        *, kernel_size=3, eps=1e-5):
    """Pure-JAX reference with identical semantics (for validation)."""
    L = conv_w.shape[0]
    pad = kernel_size // 2
    for l in range(L):
        xt = jnp.transpose(x, (0, 2, 1))                       # (B, D, T)
        y = jax.lax.conv_general_dilated(
            xt, conv_w[l], window_strides=(1,), padding=[(pad, pad)],
            dimension_numbers=("NCH", "OIH", "NCH"))
        y = y + conv_b[l][None, :, None]
        x = jnp.maximum(jnp.transpose(y, (0, 2, 1)), 0.0)      # back to (B,T,D)
        mean = jnp.mean(x, axis=-1, keepdims=True)
        var = jnp.mean(jnp.square(x - mean), axis=-1, keepdims=True)
        x = (x - mean) * jax.lax.rsqrt(var + eps) * ln_g[l] + ln_b[l]
    return jnp.dot(x, lin_w) + lin_b


if __name__ == "__main__":
    # Small, module-consistent shapes.  T=24 with t_tile=8 exercises a left
    # boundary, an interior, and a right boundary T tile.
    B, T, D = 2, 24, 32          # batch, sequence, dDim
    L, K, C = 2, 3, 8            # numOfPredictorLayer, kernelSize, numClass

    key = jax.random.PRNGKey(0)
    keys = jax.random.split(key, 8)
    scale_c = 1.0 / (D * K) ** 0.5
    scale_l = 1.0 / D ** 0.5

    x = jax.random.normal(keys[0], (B, T, D), jnp.float32)
    conv_w = jax.random.uniform(keys[1], (L, D, D, K), jnp.float32,
                                -scale_c, scale_c)             # (L, D_out, D_in, K)
    conv_b = jax.random.uniform(keys[2], (L, D), jnp.float32, -scale_c, scale_c)
    ln_g = 1.0 + 0.1 * jax.random.normal(keys[5], (L, D), jnp.float32)
    ln_b = 0.1 * jax.random.normal(keys[6], (L, D), jnp.float32)
    lin_w = jax.random.uniform(keys[3], (D, C), jnp.float32, -scale_l, scale_l)
    lin_b = jax.random.uniform(keys[4], (C,), jnp.float32, -scale_l, scale_l)

    out = predictor_forward(x, conv_w, conv_b, ln_g, ln_b, lin_w, lin_b,
                            kernel_size=K, b_duration=False, t_tile=8)
    out = jax.block_until_ready(out)

    ref = predictor_reference(x, conv_w, conv_b, ln_g, ln_b, lin_w, lin_b,
                              kernel_size=K)
    assert out.shape == (B, T, C), out.shape
    assert jnp.allclose(out, ref, rtol=1e-2, atol=1e-2), \
        float(jnp.max(jnp.abs(out - ref)))

    print("KERNEL_OK")
</pallas_src>

<mosaic_0001>
module attributes {stable_mosaic.version = 11 : i64} {
  func.func @predictor_kernel(%arg0: i32, %arg1: i32, %arg2: memref<1x8x32xf32, #tpu.memory_space<vmem>>, %arg3: memref<1x8x32xf32, #tpu.memory_space<vmem>>, %arg4: memref<1x8x32xf32, #tpu.memory_space<vmem>>, %arg5: memref<2x96x32xbf16, #tpu.memory_space<vmem>>, %arg6: memref<2x1x32xf32, #tpu.memory_space<vmem>>, %arg7: memref<2x1x32xf32, #tpu.memory_space<vmem>>, %arg8: memref<2x1x32xf32, #tpu.memory_space<vmem>>, %arg9: memref<32x8xbf16, #tpu.memory_space<vmem>>, %arg10: memref<1x8xf32, #tpu.memory_space<vmem>>, %arg11: memref<1x8x8xf32, #tpu.memory_space<vmem>>) attributes {dimension_semantics = [#tpu.dimension_semantics<parallel>, #tpu.dimension_semantics<parallel>], iteration_bounds = array<i64: 2, 3>, scalar_prefetch = 0 : i64, scratch_operands = 0 : i64, tpu.core_type = #tpu.core_type<tc>, window_params = [{transform_indices = @transform_0, window_bounds = array<i64: 1, 8, 32>}, {transform_indices = @transform_1, window_bounds = array<i64: 1, 8, 32>}, {transform_indices = @transform_2, window_bounds = array<i64: 1, 8, 32>}, {pipeline_mode = #tpu.pipeline_mode<synchronous>, transform_indices = @transform_3, window_bounds = array<i64: 2, 96, 32>}, {pipeline_mode = #tpu.pipeline_mode<synchronous>, transform_indices = @transform_4, window_bounds = array<i64: 2, 1, 32>}, {pipeline_mode = #tpu.pipeline_mode<synchronous>, transform_indices = @transform_5, window_bounds = array<i64: 2, 1, 32>}, {pipeline_mode = #tpu.pipeline_mode<synchronous>, transform_indices = @transform_6, window_bounds = array<i64: 2, 1, 32>}, {pipeline_mode = #tpu.pipeline_mode<synchronous>, transform_indices = @transform_7, window_bounds = array<i64: 32, 8>}, {pipeline_mode = #tpu.pipeline_mode<synchronous>, transform_indices = @transform_8, window_bounds = array<i64: 1, 8>}, {transform_indices = @transform_9, window_bounds = array<i64: 1, 8, 8>}]} {
    %c0 = arith.constant 0 : index
    %c0_0 = arith.constant 0 : index
    %c0_1 = arith.constant 0 : index
    %0 = vector.load %arg3[%c0, %c0_0, %c0_1] : memref<1x8x32xf32, #tpu.memory_space<vmem>>, vector<1x8x32xf32>
    %1 = vector.shape_cast %0 : vector<1x8x32xf32> to vector<8x32xf32>
    %c0_2 = arith.constant 0 : index
    %c0_3 = arith.constant 0 : index
    %c0_4 = arith.constant 0 : index
    %2 = vector.load %arg2[%c0_2, %c0_3, %c0_4] : memref<1x8x32xf32, #tpu.memory_space<vmem>>, vector<1x8x32xf32>
    %3 = vector.shape_cast %2 : vector<1x8x32xf32> to vector<8x32xf32>
    %c0_5 = arith.constant 0 : index
    %c0_6 = arith.constant 0 : index
    %c0_7 = arith.constant 0 : index
    %4 = vector.load %arg4[%c0_5, %c0_6, %c0_7] : memref<1x8x32xf32, #tpu.memory_space<vmem>>, vector<1x8x32xf32>
    %5 = vector.shape_cast %4 : vector<1x8x32xf32> to vector<8x32xf32>
    %6 = tpu.concatenate %1, %3, %5 in 0 : vector<8x32xf32>, vector<8x32xf32>, vector<8x32xf32> -> vector<24x32xf32>
    %7 = tpu.iota {dimensions = array<i32: 0>} : vector<24x1xi32>
    %c8_i32 = arith.constant 8 : i32
    %8 = arith.muli %arg1, %c8_i32 : i32
    %c8_i32_8 = arith.constant 8 : i32
    %9 = arith.subi %8, %c8_i32_8 : i32
    %10 = vector.broadcast %9 : i32 to vector<24x1xi32>
    %11 = arith.addi %7, %10 : vector<24x1xi32>
    %c0_i32 = arith.constant 0 : i32
    %12 = vector.broadcast %c0_i32 : i32 to vector<24x1xi32>
    %13 = arith.cmpi sge, %11, %12 : vector<24x1xi32>
    %c24_i32 = arith.constant 24 : i32
    %14 = vector.broadcast %c24_i32 : i32 to vector<24x1xi32>
    %15 = arith.cmpi slt, %11, %14 : vector<24x1xi32>
    %16 = arith.andi %13, %15 : vector<24x1xi1>
    %cst = arith.constant 0.000000e+00 : f32
    %17 = vector.shape_cast %16 : vector<24x1xi1> to vector<24x1xi1>
    %18 = vector.broadcast %17 : vector<24x1xi1> to vector<24x32xi1>
    %19 = vector.broadcast %cst : f32 to vector<24x32xf32>
    %20 = arith.select %18, %6, %19 : vector<24x32xi1>, vector<24x32xf32>
    %c1_i32 = arith.constant 1 : i32
    %21 = tpu.dynamic_rotate %20 by %c1_i32 dim 0 : vector<24x32xf32>, i32 -> vector<24x32xf32>
    %22 = arith.truncf %21 : vector<24x32xf32> to vector<24x32xbf16>
    %23 = arith.truncf %20 : vector<24x32xf32> to vector<24x32xbf16>
    %c23_i32 = arith.constant 23 : i32
    %24 = tpu.dynamic_rotate %20 by %c23_i32 dim 0 : vector<24x32xf32>, i32 -> vector<24x32xf32>
    %25 = arith.truncf %24 : vector<24x32xf32> to vector<24x32xbf16>
    %26 = tpu.concatenate %22, %23, %25 in 1 : vector<24x32xbf16>, vector<24x32xbf16>, vector<24x32xbf16> -> vector<24x96xbf16>
    %c0_9 = arith.constant 0 : index
    %c0_10 = arith.constant 0 : index
    %c0_11 = arith.constant 0 : index
    %27 = vector.load %arg5[%c0_9, %c0_10, %c0_11] : memref<2x96x32xbf16, #tpu.memory_space<vmem>>, vector<1x96x32xbf16>
    %28 = vector.shape_cast %27 : vector<1x96x32xbf16> to vector<96x32xbf16>
    %cst_12 = arith.constant dense<0.000000e+00> : vector<24x32xf32>
    %29 = tpu.matmul %26, %28, %cst_12 {dimension_numbers = #tpu.dot_dimension_numbers<[1], [0], [0], [1], [0, 0, 1, 1], [], []>} : vector<24x96xbf16>, vector<96x32xbf16>, vector<24x32xf32> -> vector<24x32xf32>
    %c0_13 = arith.constant 0 : index
    %c0_14 = arith.constant 0 : index
    %c0_15 = arith.constant 0 : index
    %30 = vector.load %arg6[%c0_13, %c0_14, %c0_15] : memref<2x1x32xf32, #tpu.memory_space<vmem>>, vector<1x1x32xf32>
    %31 = vector.shape_cast %30 : vector<1x1x32xf32> to vector<1x32xf32>
    %32 = vector.broadcast %31 : vector<1x32xf32> to vector<24x32xf32>
    %33 = arith.addf %29, %32 : vector<24x32xf32>
    %cst_16 = arith.constant 0.000000e+00 : f32
    %34 = vector.broadcast %cst_16 : f32 to vector<24x32xf32>
    %35 = arith.maximumf %33, %34 : vector<24x32xf32>
    %cst_17 = arith.constant dense<0.000000e+00> : vector<24xf32>
    %36 = vector.multi_reduction <add>, %35, %cst_17 [1] : vector<24x32xf32> to vector<24xf32>
    %37 = vector.shape_cast %36 : vector<24xf32> to vector<24x1xf32>
    %cst_18 = arith.constant 3.200000e+01 : f32
    %38 = vector.broadcast %cst_18 : f32 to vector<24x1xf32>
    %39 = arith.divf %37, %38 : vector<24x1xf32>
    %40 = vector.broadcast %39 : vector<24x1xf32> to vector<24x32xf32>
    %41 = arith.subf %35, %40 : vector<24x32xf32>
    %42 = arith.mulf %41, %41 : vector<24x32xf32>
    %cst_19 = arith.constant dense<0.000000e+00> : vector<24xf32>
    %43 = vector.multi_reduction <add>, %42, %cst_19 [1] : vector<24x32xf32> to vector<24xf32>
    %44 = vector.shape_cast %43 : vector<24xf32> to vector<24x1xf32>
    %cst_20 = arith.constant 3.200000e+01 : f32
    %45 = vector.broadcast %cst_20 : f32 to vector<24x1xf32>
    %46 = arith.divf %44, %45 : vector<24x1xf32>
    %47 = vector.broadcast %39 : vector<24x1xf32> to vector<24x32xf32>
    %48 = arith.subf %35, %47 : vector<24x32xf32>
    %cst_21 = arith.constant 9.99999974E-6 : f32
    %49 = vector.broadcast %cst_21 : f32 to vector<24x1xf32>
    %50 = arith.addf %46, %49 : vector<24x1xf32>
    %51 = math.rsqrt %50 : vector<24x1xf32>
    %52 = vector.broadcast %51 : vector<24x1xf32> to vector<24x32xf32>
    %53 = arith.mulf %48, %52 : vector<24x32xf32>
    %c0_22 = arith.constant 0 : index
    %c0_23 = arith.constant 0 : index
    %c0_24 = arith.constant 0 : index
    %54 = vector.load %arg7[%c0_22, %c0_23, %c0_24] : memref<2x1x32xf32, #tpu.memory_space<vmem>>, vector<1x1x32xf32>
    %55 = vector.shape_cast %54 : vector<1x1x32xf32> to vector<1x32xf32>
    %56 = vector.broadcast %55 : vector<1x32xf32> to vector<24x32xf32>
    %57 = arith.mulf %53, %56 : vector<24x32xf32>
    %c0_25 = arith.constant 0 : index
    %c0_26 = arith.constant 0 : index
    %c0_27 = arith.constant 0 : index
    %58 = vector.load %arg8[%c0_25, %c0_26, %c0_27] : memref<2x1x32xf32, #tpu.memory_space<vmem>>, vector<1x1x32xf32>
    %59 = vector.shape_cast %58 : vector<1x1x32xf32> to vector<1x32xf32>
    %60 = vector.broadcast %59 : vector<1x32xf32> to vector<24x32xf32>
    %61 = arith.addf %57, %60 : vector<24x32xf32>
    %cst_28 = arith.constant 0.000000e+00 : f32
    %62 = vector.shape_cast %16 : vector<24x1xi1> to vector<24x1xi1>
    %63 = vector.broadcast %62 : vector<24x1xi1> to vector<24x32xi1>
    %64 = vector.broadcast %cst_28 : f32 to vector<24x32xf32>
    %65 = arith.select %63, %61, %64 : vector<24x32xi1>, vector<24x32xf32>
    %c1_i32_29 = arith.constant 1 : i32
    %66 = tpu.dynamic_rotate %65 by %c1_i32_29 dim 0 : vector<24x32xf32>, i32 -> vector<24x32xf32>
    %67 = arith.truncf %66 : vector<24x32xf32> to vector<24x32xbf16>
    %68 = arith.truncf %65 : vector<24x32xf32> to vector<24x32xbf16>
    %c23_i32_30 = arith.constant 23 : i32
    %69 = tpu.dynamic_rotate %65 by %c23_i32_30 dim 0 : vector<24x32xf32>, i32 -> vector<24x32xf32>
    %70 = arith.truncf %69 : vector<24x32xf32> to vector<24x32xbf16>
    %71 = tpu.concatenate %67, %68, %70 in 1 : vector<24x32xbf16>, vector<24x32xbf16>, vector<24x32xbf16> -> vector<24x96xbf16>
    %c1 = arith.constant 1 : index
    %c0_31 = arith.constant 0 : index
    %c0_32 = arith.constant 0 : index
    %72 = vector.load %arg5[%c1, %c0_31, %c0_32] : memref<2x96x32xbf16, #tpu.memory_space<vmem>>, vector<1x96x32xbf16>
    %73 = vector.shape_cast %72 : vector<1x96x32xbf16> to vector<96x32xbf16>
    %cst_33 = arith.constant dense<0.000000e+00> : vector<24x32xf32>
    %74 = tpu.matmul %71, %73, %cst_33 {dimension_numbers = #tpu.dot_dimension_numbers<[1], [0], [0], [1], [0, 0, 1, 1], [], []>} : vector<24x96xbf16>, vector<96x32xbf16>, vector<24x32xf32> -> vector<24x32xf32>
    %c1_34 = arith.constant 1 : index
    %c0_35 = arith.constant 0 : index
    %c0_36 = arith.constant 0 : index
    %75 = vector.load %arg6[%c1_34, %c0_35, %c0_36] : memref<2x1x32xf32, #tpu.memory_space<vmem>>, vector<1x1x32xf32>
    %76 = vector.shape_cast %75 : vector<1x1x32xf32> to vector<1x32xf32>
    %77 = vector.broadcast %76 : vector<1x32xf32> to vector<24x32xf32>
    %78 = arith.addf %74, %77 : vector<24x32xf32>
    %cst_37 = arith.constant 0.000000e+00 : f32
    %79 = vector.broadcast %cst_37 : f32 to vector<24x32xf32>
    %80 = arith.maximumf %78, %79 : vector<24x32xf32>
    %cst_38 = arith.constant dense<0.000000e+00> : vector<24xf32>
    %81 = vector.multi_reduction <add>, %80, %cst_38 [1] : vector<24x32xf32> to vector<24xf32>
    %82 = vector.shape_cast %81 : vector<24xf32> to vector<24x1xf32>
    %cst_39 = arith.constant 3.200000e+01 : f32
    %83 = vector.broadcast %cst_39 : f32 to vector<24x1xf32>
    %84 = arith.divf %82, %83 : vector<24x1xf32>
    %85 = vector.broadcast %84 : vector<24x1xf32> to vector<24x32xf32>
    %86 = arith.subf %80, %85 : vector<24x32xf32>
    %87 = arith.mulf %86, %86 : vector<24x32xf32>
    %cst_40 = arith.constant dense<0.000000e+00> : vector<24xf32>
    %88 = vector.multi_reduction <add>, %87, %cst_40 [1] : vector<24x32xf32> to vector<24xf32>
    %89 = vector.shape_cast %88 : vector<24xf32> to vector<24x1xf32>
    %cst_41 = arith.constant 3.200000e+01 : f32
    %90 = vector.broadcast %cst_41 : f32 to vector<24x1xf32>
    %91 = arith.divf %89, %90 : vector<24x1xf32>
    %92 = vector.broadcast %84 : vector<24x1xf32> to vector<24x32xf32>
    %93 = arith.subf %80, %92 : vector<24x32xf32>
    %cst_42 = arith.constant 9.99999974E-6 : f32
    %94 = vector.broadcast %cst_42 : f32 to vector<24x1xf32>
    %95 = arith.addf %91, %94 : vector<24x1xf32>
    %96 = math.rsqrt %95 : vector<24x1xf32>
    %97 = vector.broadcast %96 : vector<24x1xf32> to vector<24x32xf32>
    %98 = arith.mulf %93, %97 : vector<24x32xf32>
    %c1_43 = arith.constant 1 : index
    %c0_44 = arith.constant 0 : index
    %c0_45 = arith.constant 0 : index
    %99 = vector.load %arg7[%c1_43, %c0_44, %c0_45] : memref<2x1x32xf32, #tpu.memory_space<vmem>>, vector<1x1x32xf32>
    %100 = vector.shape_cast %99 : vector<1x1x32xf32> to vector<1x32xf32>
    %101 = vector.broadcast %100 : vector<1x32xf32> to vector<24x32xf32>
    %102 = arith.mulf %98, %101 : vector<24x32xf32>
    %c1_46 = arith.constant 1 : index
    %c0_47 = arith.constant 0 : index
    %c0_48 = arith.constant 0 : index
    %103 = vector.load %arg8[%c1_46, %c0_47, %c0_48] : memref<2x1x32xf32, #tpu.memory_space<vmem>>, vector<1x1x32xf32>
    %104 = vector.shape_cast %103 : vector<1x1x32xf32> to vector<1x32xf32>
    %105 = vector.broadcast %104 : vector<1x32xf32> to vector<24x32xf32>
    %106 = arith.addf %102, %105 : vector<24x32xf32>
    %107 = vector.extract_strided_slice %106 {offsets = [8, 0], sizes = [8, 32], strides = [1, 1]} : vector<24x32xf32> to vector<8x32xf32>
    %108 = arith.truncf %107 : vector<8x32xf32> to vector<8x32xbf16>
    %c0_49 = arith.constant 0 : index
    %c0_50 = arith.constant 0 : index
    %109 = vector.load %arg9[%c0_49, %c0_50] : memref<32x8xbf16, #tpu.memory_space<vmem>>, vector<32x8xbf16>
    %cst_51 = arith.constant dense<0.000000e+00> : vector<8x8xf32>
    %110 = tpu.matmul %108, %109, %cst_51 {dimension_numbers = #tpu.dot_dimension_numbers<[1], [0], [0], [1], [0, 0, 1, 1], [], []>} : vector<8x32xbf16>, vector<32x8xbf16>, vector<8x8xf32> -> vector<8x8xf32>
    %c0_52 = arith.constant 0 : index
    %c0_53 = arith.constant 0 : index
    %111 = vector.load %arg10[%c0_52, %c0_53] : memref<1x8xf32, #tpu.memory_space<vmem>>, vector<1x8xf32>
    %112 = vector.broadcast %111 : vector<1x8xf32> to vector<8x8xf32>
    %113 = arith.addf %110, %112 : vector<8x8xf32>
    %c0_54 = arith.constant 0 : index
    %c0_55 = arith.constant 0 : index
    %c0_56 = arith.constant 0 : index
    %114 = vector.load %arg11[%c0_54, %c0_55, %c0_56] : memref<1x8x8xf32, #tpu.memory_space<vmem>>, vector<1x8x8xf32>
    %115 = vector.shape_cast %114 : vector<1x8x8xf32> to vector<8x8xf32>
    %116 = vector.shape_cast %113 : vector<8x8xf32> to vector<1x8x8xf32>
    tpu.vector_store %arg11[%c0_54, %c0_55, %c0_56], %116 {strides = array<i32>} : memref<1x8x8xf32, #tpu.memory_space<vmem>>, vector<1x8x8xf32>,
    return
  }
  func.func @transform_0(%arg0: i32, %arg1: i32) -> (i32, i32, i32) {
    %c0_i32 = arith.constant 0 : i32
    %c0_i32_0 = arith.constant 0 : i32
    return %arg0, %arg1, %c0_i32 : i32, i32, i32
  }
  func.func @transform_1(%arg0: i32, %arg1: i32) -> (i32, i32, i32) {
    %c1_i32 = arith.constant 1 : i32
    %0 = arith.muli %arg1, %c1_i32 : i32
    %c1_i32_0 = arith.constant 1 : i32
    %1 = arith.subi %0, %c1_i32_0 : i32
    %c0_i32 = arith.constant 0 : i32
    %2 = arith.maxsi %1, %c0_i32 : i32
    %c0_i32_1 = arith.constant 0 : i32
    %c0_i32_2 = arith.constant 0 : i32
    return %arg0, %2, %c0_i32_1 : i32, i32, i32
  }
  func.func @transform_2(%arg0: i32, %arg1: i32) -> (i32, i32, i32) {
    %c1_i32 = arith.constant 1 : i32
    %0 = arith.addi %arg1, %c1_i32 : i32
    %c1_i32_0 = arith.constant 1 : i32
    %1 = arith.muli %0, %c1_i32_0 : i32
    %c2_i32 = arith.constant 2 : i32
    %2 = arith.minsi %1, %c2_i32 : i32
    %c0_i32 = arith.constant 0 : i32
    %c0_i32_1 = arith.constant 0 : i32
    return %arg0, %2, %c0_i32 : i32, i32, i32
  }
  func.func @transform_3(%arg0: i32, %arg1: i32) -> (i32, i32, i32) {
    %c0_i32 = arith.constant 0 : i32
    %c0_i32_0 = arith.constant 0 : i32
    %c0_i32_1 = arith.constant 0 : i32
    %c0_i32_2 = arith.constant 0 : i32
    return %c0_i32, %c0_i32_0, %c0_i32_1 : i32, i32, i32
  }
  func.func @transform_4(%arg0: i32, %arg1: i32) -> (i32, i32, i32) {
    %c0_i32 = arith.constant 0 : i32
    %c0_i32_0 = arith.constant 0 : i32
    %c0_i32_1 = arith.constant 0 : i32
    %c0_i32_2 = arith.constant 0 : i32
    return %c0_i32, %c0_i32_0, %c0_i32_1 : i32, i32, i32
  }
  func.func @transform_5(%arg0: i32, %arg1: i32) -> (i32, i32, i32) {
    %c0_i32 = arith.constant 0 : i32
    %c0_i32_0 = arith.constant 0 : i32
    %c0_i32_1 = arith.constant 0 : i32
    %c0_i32_2 = arith.constant 0 : i32
    return %c0_i32, %c0_i32_0, %c0_i32_1 : i32, i32, i32
  }
  func.func @transform_6(%arg0: i32, %arg1: i32) -> (i32, i32, i32) {
    %c0_i32 = arith.constant 0 : i32
    %c0_i32_0 = arith.constant 0 : i32
    %c0_i32_1 = arith.constant 0 : i32
    %c0_i32_2 = arith.constant 0 : i32
    return %c0_i32, %c0_i32_0, %c0_i32_1 : i32, i32, i32
  }
  func.func @transform_7(%arg0: i32, %arg1: i32) -> (i32, i32) {
    %c0_i32 = arith.constant 0 : i32
    %c0_i32_0 = arith.constant 0 : i32
    %c0_i32_1 = arith.constant 0 : i32
    return %c0_i32, %c0_i32_0 : i32, i32
  }
  func.func @transform_8(%arg0: i32, %arg1: i32) -> (i32, i32) {
    %c0_i32 = arith.constant 0 : i32
    %c0_i32_0 = arith.constant 0 : i32
    %c0_i32_1 = arith.constant 0 : i32
    return %c0_i32, %c0_i32_0 : i32, i32
  }
  func.func @transform_9(%arg0: i32, %arg1: i32) -> (i32, i32, i32) {
    %c0_i32 = arith.constant 0 : i32
    %c0_i32_0 = arith.constant 0 : i32
    return %arg0, %arg1, %c0_i32 : i32, i32, i32
  }
}

module attributes {stable_mosaic.version = 11 : i64} {
  func.func @predictor_kernel(%arg0: i32, %arg1: i32, %arg2: memref<1x8x32xf32, #tpu.memory_space<vmem>>, %arg3: memref<1x8x32xf32, #tpu.memory_space<vmem>>, %arg4: memref<1x8x32xf32, #tpu.memory_space<vmem>>, %arg5: memref<2x96x32xbf16, #tpu.memory_space<vmem>>, %arg6: memref<2x1x32xf32, #tpu.memory_space<vmem>>, %arg7: memref<2x1x32xf32, #tpu.memory_space<vmem>>, %arg8: memref<2x1x32xf32, #tpu.memory_space<vmem>>, %arg9: memref<32x8xbf16, #tpu.memory_space<vmem>>, %arg10: memref<1x8xf32, #tpu.memory_space<vmem>>, %arg11: memref<1x8x8xf32, #tpu.memory_space<vmem>>) attributes {dimension_semantics = [#tpu.dimension_semantics<parallel>, #tpu.dimension_semantics<parallel>], iteration_bounds = array<i64: 2, 3>, scalar_prefetch = 0 : i64, scratch_operands = 0 : i64, tpu.core_type = #tpu.core_type<tc>, window_params = [{transform_indices = @transform_0, window_bounds = array<i64: 1, 8, 32>}, {transform_indices = @transform_1, window_bounds = array<i64: 1, 8, 32>}, {transform_indices = @transform_2, window_bounds = array<i64: 1, 8, 32>}, {pipeline_mode = #tpu.pipeline_mode<synchronous>, transform_indices = @transform_3, window_bounds = array<i64: 2, 96, 32>}, {pipeline_mode = #tpu.pipeline_mode<synchronous>, transform_indices = @transform_4, window_bounds = array<i64: 2, 1, 32>}, {pipeline_mode = #tpu.pipeline_mode<synchronous>, transform_indices = @transform_5, window_bounds = array<i64: 2, 1, 32>}, {pipeline_mode = #tpu.pipeline_mode<synchronous>, transform_indices = @transform_6, window_bounds = array<i64: 2, 1, 32>}, {pipeline_mode = #tpu.pipeline_mode<synchronous>, transform_indices = @transform_7, window_bounds = array<i64: 32, 8>}, {pipeline_mode = #tpu.pipeline_mode<synchronous>, transform_indices = @transform_8, window_bounds = array<i64: 1, 8>}, {transform_indices = @transform_9, window_bounds = array<i64: 1, 8, 8>}]} {
    %c0 = arith.constant 0 : index
    %c0_0 = arith.constant 0 : index
    %c0_1 = arith.constant 0 : index
    %0 = vector.load %arg3[%c0, %c0_0, %c0_1] : memref<1x8x32xf32, #tpu.memory_space<vmem>>, vector<1x8x32xf32>
    %1 = vector.shape_cast %0 : vector<1x8x32xf32> to vector<8x32xf32>
    %c0_2 = arith.constant 0 : index
    %c0_3 = arith.constant 0 : index
    %c0_4 = arith.constant 0 : index
    %2 = vector.load %arg2[%c0_2, %c0_3, %c0_4] : memref<1x8x32xf32, #tpu.memory_space<vmem>>, vector<1x8x32xf32>
    %3 = vector.shape_cast %2 : vector<1x8x32xf32> to vector<8x32xf32>
    %c0_5 = arith.constant 0 : index
    %c0_6 = arith.constant 0 : index
    %c0_7 = arith.constant 0 : index
    %4 = vector.load %arg4[%c0_5, %c0_6, %c0_7] : memref<1x8x32xf32, #tpu.memory_space<vmem>>, vector<1x8x32xf32>
    %5 = vector.shape_cast %4 : vector<1x8x32xf32> to vector<8x32xf32>
    %6 = tpu.concatenate %1, %3, %5 in 0 : vector<8x32xf32>, vector<8x32xf32>, vector<8x32xf32> -> vector<24x32xf32>
    %7 = tpu.iota {dimensions = array<i32: 0>} : vector<24x1xi32>
    %c8_i32 = arith.constant 8 : i32
    %8 = arith.muli %arg1, %c8_i32 : i32
    %c8_i32_8 = arith.constant 8 : i32
    %9 = arith.subi %8, %c8_i32_8 : i32
    %10 = vector.broadcast %9 : i32 to vector<24x1xi32>
    %11 = arith.addi %7, %10 : vector<24x1xi32>
    %c0_i32 = arith.constant 0 : i32
    %12 = vector.broadcast %c0_i32 : i32 to vector<24x1xi32>
    %13 = arith.cmpi sge, %11, %12 : vector<24x1xi32>
    %c24_i32 = arith.constant 24 : i32
    %14 = vector.broadcast %c24_i32 : i32 to vector<24x1xi32>
    %15 = arith.cmpi slt, %11, %14 : vector<24x1xi32>
    %16 = arith.andi %13, %15 : vector<24x1xi1>
    %cst = arith.constant 0.000000e+00 : f32
    %17 = vector.shape_cast %16 : vector<24x1xi1> to vector<24x1xi1>
    %18 = vector.broadcast %17 : vector<24x1xi1> to vector<24x32xi1>
    %19 = vector.broadcast %cst : f32 to vector<24x32xf32>
    %20 = arith.select %18, %6, %19 : vector<24x32xi1>, vector<24x32xf32>
    %c1_i32 = arith.constant 1 : i32
    %21 = tpu.dynamic_rotate %20 by %c1_i32 dim 0 : vector<24x32xf32>, i32 -> vector<24x32xf32>
    %22 = arith.truncf %21 : vector<24x32xf32> to vector<24x32xbf16>
    %23 = arith.truncf %20 : vector<24x32xf32> to vector<24x32xbf16>
    %c23_i32 = arith.constant 23 : i32
    %24 = tpu.dynamic_rotate %20 by %c23_i32 dim 0 : vector<24x32xf32>, i32 -> vector<24x32xf32>
    %25 = arith.truncf %24 : vector<24x32xf32> to vector<24x32xbf16>
    %26 = tpu.concatenate %22, %23, %25 in 1 : vector<24x32xbf16>, vector<24x32xbf16>, vector<24x32xbf16> -> vector<24x96xbf16>
    %c0_9 = arith.constant 0 : index
    %c0_10 = arith.constant 0 : index
    %c0_11 = arith.constant 0 : index
    %27 = vector.load %arg5[%c0_9, %c0_10, %c0_11] : memref<2x96x32xbf16, #tpu.memory_space<vmem>>, vector<1x96x32xbf16>
    %28 = vector.shape_cast %27 : vector<1x96x32xbf16> to vector<96x32xbf16>
    %cst_12 = arith.constant dense<0.000000e+00> : vector<24x32xf32>
    %29 = tpu.matmul %26, %28, %cst_12 {dimension_numbers = #tpu.dot_dimension_numbers<[1], [0], [0], [1], [0, 0, 1, 1], [], []>} : vector<24x96xbf16>, vector<96x32xbf16>, vector<24x32xf32> -> vector<24x32xf32>
    %c0_13 = arith.constant 0 : index
    %c0_14 = arith.constant 0 : index
    %c0_15 = arith.constant 0 : index
    %30 = vector.load %arg6[%c0_13, %c0_14, %c0_15] : memref<2x1x32xf32, #tpu.memory_space<vmem>>, vector<1x1x32xf32>
    %31 = vector.shape_cast %30 : vector<1x1x32xf32> to vector<1x32xf32>
    %32 = vector.broadcast %31 : vector<1x32xf32> to vector<24x32xf32>
    %33 = arith.addf %29, %32 : vector<24x32xf32>
    %cst_16 = arith.constant 0.000000e+00 : f32
    %34 = vector.broadcast %cst_16 : f32 to vector<24x32xf32>
    %35 = arith.maximumf %33, %34 : vector<24x32xf32>
    %cst_17 = arith.constant dense<0.000000e+00> : vector<24xf32>
    %36 = vector.multi_reduction <add>, %35, %cst_17 [1] : vector<24x32xf32> to vector<24xf32>
    %37 = vector.shape_cast %36 : vector<24xf32> to vector<24x1xf32>
    %cst_18 = arith.constant 3.200000e+01 : f32
    %38 = vector.broadcast %cst_18 : f32 to vector<24x1xf32>
    %39 = arith.divf %37, %38 : vector<24x1xf32>
    %40 = vector.broadcast %39 : vector<24x1xf32> to vector<24x32xf32>
    %41 = arith.subf %35, %40 : vector<24x32xf32>
    %42 = arith.mulf %41, %41 : vector<24x32xf32>
    %cst_19 = arith.constant dense<0.000000e+00> : vector<24xf32>
    %43 = vector.multi_reduction <add>, %42, %cst_19 [1] : vector<24x32xf32> to vector<24xf32>
    %44 = vector.shape_cast %43 : vector<24xf32> to vector<24x1xf32>
    %cst_20 = arith.constant 3.200000e+01 : f32
    %45 = vector.broadcast %cst_20 : f32 to vector<24x1xf32>
    %46 = arith.divf %44, %45 : vector<24x1xf32>
    %47 = vector.broadcast %39 : vector<24x1xf32> to vector<24x32xf32>
    %48 = arith.subf %35, %47 : vector<24x32xf32>
    %cst_21 = arith.constant 9.99999974E-6 : f32
    %49 = vector.broadcast %cst_21 : f32 to vector<24x1xf32>
    %50 = arith.addf %46, %49 : vector<24x1xf32>
    %51 = math.rsqrt %50 : vector<24x1xf32>
    %52 = vector.broadcast %51 : vector<24x1xf32> to vector<24x32xf32>
    %53 = arith.mulf %48, %52 : vector<24x32xf32>
    %c0_22 = arith.constant 0 : index
    %c0_23 = arith.constant 0 : index
    %c0_24 = arith.constant 0 : index
    %54 = vector.load %arg7[%c0_22, %c0_23, %c0_24] : memref<2x1x32xf32, #tpu.memory_space<vmem>>, vector<1x1x32xf32>
    %55 = vector.shape_cast %54 : vector<1x1x32xf32> to vector<1x32xf32>
    %56 = vector.broadcast %55 : vector<1x32xf32> to vector<24x32xf32>
    %57 = arith.mulf %53, %56 : vector<24x32xf32>
    %c0_25 = arith.constant 0 : index
    %c0_26 = arith.constant 0 : index
    %c0_27 = arith.constant 0 : index
    %58 = vector.load %arg8[%c0_25, %c0_26, %c0_27] : memref<2x1x32xf32, #tpu.memory_space<vmem>>, vector<1x1x32xf32>
    %59 = vector.shape_cast %58 : vector<1x1x32xf32> to vector<1x32xf32>
    %60 = vector.broadcast %59 : vector<1x32xf32> to vector<24x32xf32>
    %61 = arith.addf %57, %60 : vector<24x32xf32>
    %cst_28 = arith.constant 0.000000e+00 : f32
    %62 = vector.shape_cast %16 : vector<24x1xi1> to vector<24x1xi1>
    %63 = vector.broadcast %62 : vector<24x1xi1> to vector<24x32xi1>
    %64 = vector.broadcast %cst_28 : f32 to vector<24x32xf32>
    %65 = arith.select %63, %61, %64 : vector<24x32xi1>, vector<24x32xf32>
    %c1_i32_29 = arith.constant 1 : i32
    %66 = tpu.dynamic_rotate %65 by %c1_i32_29 dim 0 : vector<24x32xf32>, i32 -> vector<24x32xf32>
    %67 = arith.truncf %66 : vector<24x32xf32> to vector<24x32xbf16>
    %68 = arith.truncf %65 : vector<24x32xf32> to vector<24x32xbf16>
    %c23_i32_30 = arith.constant 23 : i32
    %69 = tpu.dynamic_rotate %65 by %c23_i32_30 dim 0 : vector<24x32xf32>, i32 -> vector<24x32xf32>
    %70 = arith.truncf %69 : vector<24x32xf32> to vector<24x32xbf16>
    %71 = tpu.concatenate %67, %68, %70 in 1 : vector<24x32xbf16>, vector<24x32xbf16>, vector<24x32xbf16> -> vector<24x96xbf16>
    %c1 = arith.constant 1 : index
    %c0_31 = arith.constant 0 : index
    %c0_32 = arith.constant 0 : index
    %72 = vector.load %arg5[%c1, %c0_31, %c0_32] : memref<2x96x32xbf16, #tpu.memory_space<vmem>>, vector<1x96x32xbf16>
    %73 = vector.shape_cast %72 : vector<1x96x32xbf16> to vector<96x32xbf16>
    %cst_33 = arith.constant dense<0.000000e+00> : vector<24x32xf32>
    %74 = tpu.matmul %71, %73, %cst_33 {dimension_numbers = #tpu.dot_dimension_numbers<[1], [0], [0], [1], [0, 0, 1, 1], [], []>} : vector<24x96xbf16>, vector<96x32xbf16>, vector<24x32xf32> -> vector<24x32xf32>
    %c1_34 = arith.constant 1 : index
    %c0_35 = arith.constant 0 : index
    %c0_36 = arith.constant 0 : index
    %75 = vector.load %arg6[%c1_34, %c0_35, %c0_36] : memref<2x1x32xf32, #tpu.memory_space<vmem>>, vector<1x1x32xf32>
    %76 = vector.shape_cast %75 : vector<1x1x32xf32> to vector<1x32xf32>
    %77 = vector.broadcast %76 : vector<1x32xf32> to vector<24x32xf32>
    %78 = arith.addf %74, %77 : vector<24x32xf32>
    %cst_37 = arith.constant 0.000000e+00 : f32
    %79 = vector.broadcast %cst_37 : f32 to vector<24x32xf32>
    %80 = arith.maximumf %78, %79 : vector<24x32xf32>
    %cst_38 = arith.constant dense<0.000000e+00> : vector<24xf32>
    %81 = vector.multi_reduction <add>, %80, %cst_38 [1] : vector<24x32xf32> to vector<24xf32>
    %82 = vector.shape_cast %81 : vector<24xf32> to vector<24x1xf32>
    %cst_39 = arith.constant 3.200000e+01 : f32
    %83 = vector.broadcast %cst_39 : f32 to vector<24x1xf32>
    %84 = arith.divf %82, %83 : vector<24x1xf32>
    %85 = vector.broadcast %84 : vector<24x1xf32> to vector<24x32xf32>
    %86 = arith.subf %80, %85 : vector<24x32xf32>
    %87 = arith.mulf %86, %86 : vector<24x32xf32>
    %cst_40 = arith.constant dense<0.000000e+00> : vector<24xf32>
    %88 = vector.multi_reduction <add>, %87, %cst_40 [1] : vector<24x32xf32> to vector<24xf32>
    %89 = vector.shape_cast %88 : vector<24xf32> to vector<24x1xf32>
    %cst_41 = arith.constant 3.200000e+01 : f32
    %90 = vector.broadcast %cst_41 : f32 to vector<24x1xf32>
    %91 = arith.divf %89, %90 : vector<24x1xf32>
    %92 = vector.broadcast %84 : vector<24x1xf32> to vector<24x32xf32>
    %93 = arith.subf %80, %92 : vector<24x32xf32>
    %cst_42 = arith.constant 9.99999974E-6 : f32
    %94 = vector.broadcast %cst_42 : f32 to vector<24x1xf32>
    %95 = arith.addf %91, %94 : vector<24x1xf32>
    %96 = math.rsqrt %95 : vector<24x1xf32>
    %97 = vector.broadcast %96 : vector<24x1xf32> to vector<24x32xf32>
    %98 = arith.mulf %93, %97 : vector<24x32xf32>
    %c1_43 = arith.constant 1 : index
    %c0_44 = arith.constant 0 : index
    %c0_45 = arith.constant 0 : index
    %99 = vector.load %arg7[%c1_43, %c0_44, %c0_45] : memref<2x1x32xf32, #tpu.memory_space<vmem>>, vector<1x1x32xf32>
    %100 = vector.shape_cast %99 : vector<1x1x32xf32> to vector<1x32xf32>
    %101 = vector.broadcast %100 : vector<1x32xf32> to vector<24x32xf32>
    %102 = arith.mulf %98, %101 : vector<24x32xf32>
    %c1_46 = arith.constant 1 : index
    %c0_47 = arith.constant 0 : index
    %c0_48 = arith.constant 0 : index
    %103 = vector.load %arg8[%c1_46, %c0_47, %c0_48] : memref<2x1x32xf32, #tpu.memory_space<vmem>>, vector<1x1x32xf32>
    %104 = vector.shape_cast %103 : vector<1x1x32xf32> to vector<1x32xf32>
    %105 = vector.broadcast %104 : vector<1x32xf32> to vector<24x32xf32>
    %106 = arith.addf %102, %105 : vector<24x32xf32>
    %107 = vector.extract_strided_slice %106 {offsets = [8, 0], sizes = [8, 32], strides = [1, 1]} : vector<24x32xf32> to vector<8x32xf32>
    %108 = arith.truncf %107 : vector<8x32xf32> to vector<8x32xbf16>
    %c0_49 = arith.constant 0 : index
    %c0_50 = arith.constant 0 : index
    %109 = vector.load %arg9[%c0_49, %c0_50] : memref<32x8xbf16, #tpu.memory_space<vmem>>, vector<32x8xbf16>
    %cst_51 = arith.constant dense<0.000000e+00> : vector<8x8xf32>
    %110 = tpu.matmul %108, %109, %cst_51 {dimension_numbers = #tpu.dot_dimension_numbers<[1], [0], [0], [1], [0, 0, 1, 1], [], []>} : vector<8x32xbf16>, vector<32x8xbf16>, vector<8x8xf32> -> vector<8x8xf32>
    %c0_52 = arith.constant 0 : index
    %c0_53 = arith.constant 0 : index
    %111 = vector.load %arg10[%c0_52, %c0_53] : memref<1x8xf32, #tpu.memory_space<vmem>>, vector<1x8xf32>
    %112 = vector.broadcast %111 : vector<1x8xf32> to vector<8x8xf32>
    %113 = arith.addf %110, %112 : vector<8x8xf32>
    %c0_54 = arith.constant 0 : index
    %c0_55 = arith.constant 0 : index
    %c0_56 = arith.constant 0 : index
    %114 = vector.load %arg11[%c0_54, %c0_55, %c0_56] : memref<1x8x8xf32, #tpu.memory_space<vmem>>, vector<1x8x8xf32>
    %115 = vector.shape_cast %114 : vector<1x8x8xf32> to vector<8x8xf32>
    %116 = vector.shape_cast %113 : vector<8x8xf32> to vector<1x8x8xf32>
    tpu.vector_store %arg11[%c0_54, %c0_55, %c0_56], %116 {strides = array<i32>} : memref<1x8x8xf32, #tpu.memory_space<vmem>>, vector<1x8x8xf32>,
    return
  }
  func.func @transform_0(%arg0: i32, %arg1: i32) -> (i32, i32, i32) {
    %c0_i32 = arith.constant 0 : i32
    %c0_i32_0 = arith.constant 0 : i32
    return %arg0, %arg1, %c0_i32 : i32, i32, i32
  }
  func.func @transform_1(%arg0: i32, %arg1: i32) -> (i32, i32, i32) {
    %c1_i32 = arith.constant 1 : i32
    %0 = arith.muli %arg1, %c1_i32 : i32
    %c1_i32_0 = arith.constant 1 : i32
    %1 = arith.subi %0, %c1_i32_0 : i32
    %c0_i32 = arith.constant 0 : i32
    %2 = arith.maxsi %1, %c0_i32 : i32
    %c0_i32_1 = arith.constant 0 : i32
    %c0_i32_2 = arith.constant 0 : i32
    return %arg0, %2, %c0_i32_1 : i32, i32, i32
  }
  func.func @transform_2(%arg0: i32, %arg1: i32) -> (i32, i32, i32) {
    %c1_i32 = arith.constant 1 : i32
    %0 = arith.addi %arg1, %c1_i32 : i32
    %c1_i32_0 = arith.constant 1 : i32
    %1 = arith.muli %0, %c1_i32_0 : i32
    %c2_i32 = arith.constant 2 : i32
    %2 = arith.minsi %1, %c2_i32 : i32
    %c0_i32 = arith.constant 0 : i32
    %c0_i32_1 = arith.constant 0 : i32
    return %arg0, %2, %c0_i32 : i32, i32, i32
  }
  func.func @transform_3(%arg0: i32, %arg1: i32) -> (i32, i32, i32) {
    %c0_i32 = arith.constant 0 : i32
    %c0_i32_0 = arith.constant 0 : i32
    %c0_i32_1 = arith.constant 0 : i32
    %c0_i32_2 = arith.constant 0 : i32
    return %c0_i32, %c0_i32_0, %c0_i32_1 : i32, i32, i32
  }
  func.func @transform_4(%arg0: i32, %arg1: i32) -> (i32, i32, i32) {
    %c0_i32 = arith.constant 0 : i32
    %c0_i32_0 = arith.constant 0 : i32
    %c0_i32_1 = arith.constant 0 : i32
    %c0_i32_2 = arith.constant 0 : i32
    return %c0_i32, %c0_i32_0, %c0_i32_1 : i32, i32, i32
  }
  func.func @transform_5(%arg0: i32, %arg1: i32) -> (i32, i32, i32) {
    %c0_i32 = arith.constant 0 : i32
    %c0_i32_0 = arith.constant 0 : i32
    %c0_i32_1 = arith.constant 0 : i32
    %c0_i32_2 = arith.constant 0 : i32
    return %c0_i32, %c0_i32_0, %c0_i32_1 : i32, i32, i32
  }
  func.func @transform_6(%arg0: i32, %arg1: i32) -> (i32, i32, i32) {
    %c0_i32 = arith.constant 0 : i32
    %c0_i32_0 = arith.constant 0 : i32
    %c0_i32_1 = arith.constant 0 : i32
    %c0_i32_2 = arith.constant 0 : i32
    return %c0_i32, %c0_i32_0, %c0_i32_1 : i32, i32, i32
  }
  func.func @transform_7(%arg0: i32, %arg1: i32) -> (i32, i32) {
    %c0_i32 = arith.constant 0 : i32
    %c0_i32_0 = arith.constant 0 : i32
    %c0_i32_1 = arith.constant 0 : i32
    return %c0_i32, %c0_i32_0 : i32, i32
  }
  func.func @transform_8(%arg0: i32, %arg1: i32) -> (i32, i32) {
    %c0_i32 = arith.constant 0 : i32
    %c0_i32_0 = arith.constant 0 : i32
    %c0_i32_1 = arith.constant 0 : i32
    return %c0_i32, %c0_i32_0 : i32, i32
  }
  func.func @transform_9(%arg0: i32, %arg1: i32) -> (i32, i32, i32) {
    %c0_i32 = arith.constant 0 : i32
    %c0_i32_0 = arith.constant 0 : i32
    return %arg0, %arg1, %c0_i32 : i32, i32, i32
  }
}

</mosaic_0001>

<bundles_post_ra>
// kernel: tpu_custom_call.1
= control target key start
LH: loop header
LB: loop body
LE: loop exit
PB: predicated region body
PF: predicated region fallthrough
CT: control target
= control target key end

     0   :  { %s1375_s30 = smov 0   ;;  %s1377_s10 = smov 0   ;;  %s1611_s0 = inlined_call_operand.vmem [shape: f32[2,24,32], index: 0, kind: input, shape index: {}]   ;;  %s1612_s1 = inlined_call_operand.vmem [shape: f32[2,24,32], index: 1, kind: input, shape index: {}]   ;;  %s1613_s2 = inlined_call_operand.vmem [shape: f32[2,24,32], index: 2, kind: input, shape index: {}]   ;;  %s1614_s3 = inlined_call_operand.vmem [shape: bf16[2,96,32], index: 3, kind: input, shape index: {}]   ;;  %s1615_s4 = inlined_call_operand.vmem [shape: f32[2,1,32], index: 4, kind: input, shape index: {}]   ;;  %s1616_s5 = inlined_call_operand.vmem [shape: f32[2,1,32], index: 5, kind: input, shape index: {}]   ;;  %s1617_s6 = inlined_call_operand.vmem [shape: f32[2,1,32], index: 6, kind: input, shape index: {}]   ;;  %s1618_s7 = inlined_call_operand.vmem [shape: bf16[32,8], index: 7, kind: input, shape index: {}]   ;;  %s1619_s8 = inlined_call_operand.vmem [shape: f32[1,8], index: 8, kind: input, shape index: {}]   ;;  %s1620_s9 = inlined_call_operand.vmem [shape: f32[2,24,8], index: 9, kind: output, shape index: {}]  }
   0x1   :  { %s1379_s11 = smov 0   ;;  %s1381_s12 = smov 0  }
   0x2   :  { %s1383_s13 = smov 0  }
   0x3 LB: > { %s28_s14 = sadd.s32 1, %s1311_s11  ;;  %s31_s15 = sadd.s32 1, %s1315_s12  ;;  %s1319_s13 = sphi %s1383_s13, %s19_s13   ;;  %s1315_s12 = sphi %s1381_s12, %s1631_s12   ;;  %s1311_s11 = sphi %s1379_s11, %s1630_s11   ;;  %s1307_s10 = sphi %s1377_s10, %s1629_s10   ;;  %s1303_s30 = sphi %s1375_s30, %s1628_s30  }
   0x4   : > { %p29_p0 = scmp.ge.s32.totalorder %s28_s14, 3  ;;  %p1094_p1 = scmp.ge.s32.totalorder %s1319_s13, 1 }
   0x5   : > { %p360_p2 = scmp.lt.s32.totalorder %s1319_s13, 7 }
   0x6   : > { %s1633_s14 = smov (%p29_p0, %s28_s14), 0  ;;  %s1635_s15 = smov (!%p29_p0, %s31_s15), %s1315_s12 }
   0x7   : > { %p361_p3 = pnand %p1094_p1, %p360_p2  ;;  %p33_p4 = scmp.ge.s32.totalorder %s1635_s15, 2 }
   0x8   : > { %p424_p5 = scmp.lt.s32.totalorder (!%p361_p3), %s1307_s10, 1  ;;  %p426_p6 = scmp.lt.s32.totalorder (!%p361_p3), %s1303_s30, 2 }
   0x9   : > { %s1637_s15 = smov (%p33_p4, %s1635_s15), 0  ;;  %364 = sbr.rel (%p361_p3) target bundleno = 1502 (0x5de), region = 56 }
   0xa   : > { %s1409_s16 = sadd.s32 (!%p361_p3), 4294967295, %s1303_s30  ;;  %s1108_s17 = sshll.u32 (!%p361_p3), %s1303_s30, 3 }
   0xb   : > { %p433_p7 = scmp.gt.s32.totalorder (!%p361_p3), %s1409_s16, 0  ;;  %s1109_s26 = sadd.s32 (!%p361_p3), 4294967288, %s1108_s17 }
   0xc   : > { %p1097_p8 = scmp.lt.s32.totalorder (!%p361_p3), %s1409_s16, 2  ;;  %s446_s29 = sadd.s32 (!%p361_p3), 1, %s1303_s30 }
   0xd   : > { %p1443_p9 = scmp.lt.s32.totalorder (!%p361_p3), %s446_s29, 2  ;;  %s1321_s21 = smov (!%p361_p3), 32  }
   0xe   : > { %v472_v0 = vlaneseq  ;;  %v1259_v1 = vld [vmem:[%s1614_s3 + $0x28] sm:$0xff]   ;;  %v1260_v2 = vld [vmem:[%s1614_s3 + $0x20] sm:$0xff]   ;;  %s1639_s10 = smov (!%p424_p5, %s1307_s10), 1  ;;  %v1261_v5 = vld [vmem:[%s1614_s3 + $0x18] sm:$0xff]   ;;  %v478_v7 = vstv %s1109_s26  ;;  %vm532_vm11 = vcmask 261120   ;;  %vm539_vm12 = vcmask 523264  }
   0xf   : > { %s427_s22 = scalar_select %p426_p6, %s1303_s30, 2  ;;  %1174 = vmatprep.subr.bf16.mxu0 %v1259_v1  ;;  %v1262_v10 = vld [vmem:[%s1614_s3 + $0x10] sm:$0xff]   ;;  %v1263_v14 = vld [vmem:[%s1614_s3 + $0x8] sm:$0xff]   ;;  %v1264_v20 = vld [vmem:[%s1614_s3] sm:$0xff]   ;;  %vm599_vm13 = vcmask 785408   ;;  %vm1324_vm14 = vmmov 0  }
  0x10   : > { %v1418_v3 = vshrl.u32 %v472_v0, 7  ;;  %s1421_s23 = smul.u32 3, %s1639_s10  ;;  %1175 = vmatpush3.bf16.msra.mxu0 %v1259_v1  ;;  %s1643_s29 = smov (!%p1443_p9, %s446_s29), 2  ;;  %v1110_v50 = vld [vmem:[%s1615_s4] ss:$0 sm:$0xff]  ;;  %vm964_vm15 = vcmask 64512  }
  0x11   : > { %1176 = vmatprep.subr.bf16.mxu0 %v1260_v2  ;;  %s434_s17 = scalar_select %p433_p7, %s1409_s16, 0 }
  0x12   : > { %v474_v4 = vadd.s32 8, %v1418_v3  ;;  %s429_s27 = sadd.s32 %s1421_s23, %s427_s22  ;;  %v475_v6 = vadd.s32 16, %v1418_v3  ;;  %v479_v8 = vadd.s32 %v478_v7, %v1418_v3  ;;  %s1645_s29 = smov (!%p1443_p9, %s1643_s29), 2  ;;  %vm503_vm8 = vcmp.lt.s32.totalorder %v1418_v3, 1 }
  0x13   : > { %s1431_s28 = sshll.u32 %s429_s27, 3  ;;  %s1641_s17 = smov (!%p1097_p8, %s434_s17), 2  ;;  %vm514_vm10 = vcmp.lt.s32.totalorder %v1418_v3, 7 }
  0x14   : > { %v480_v9 = vadd.s32 %v478_v7, %v474_v4  ;;  %s431_s19 = scalar_lea.vmem %s1611_s0, %s1431_s28  ;;  %1177 = vmatpush3.bf16.msra.mxu0 %v1260_v2  ;;  %v481_v12 = vadd.s32 %v478_v7, %v475_v6  ;;  %vm482_vm2 = vcmp.ge.s32.totalorder %v479_v8, 0  ;;  %vm485_vm3 = vcmp.lt.s32.totalorder %v479_v8, 24  ;;  %s440_s30 = sadd.s32 %s1421_s23, %s1641_s17 }
  0x15   : > { %1178 = vmatprep.subr.bf16.mxu0 %v1261_v5  ;;  %v470_v11 = vld [vmem:[%s431_s19] sm:$0xff]  ;;  %s1102_s26 = sshll.u32 %s440_s30, 3  ;;  %vm1459_vm5 = vmand %vm482_vm2, %vm485_vm3  ;;  %s454_s17 = sadd.s32 %s1421_s23, %s1645_s29 }
  0x16   : > { %vm483_vm0 = vcmp.ge.s32.totalorder %v480_v9, 0  ;;  %vm486_vm1 = vcmp.lt.s32.totalorder %v480_v9, 24  ;;  %vm484_vm6 = vcmp.ge.s32.totalorder %v481_v12, 0  ;;  %s442_s10 = scalar_lea.vmem %s1612_s1, %s1102_s26  ;;  %vm487_vm7 = vcmp.lt.s32.totalorder %v481_v12, 24  ;;  %s1106_s20 = sshll.u32 %s454_s17, 3 }
  0x17   : > { %vm1449_vm4 = vmand %vm483_vm0, %vm486_vm1  ;;  %v469_v18 = vld [vmem:[%s442_s10] sm:$0xff]  ;;  %s456_s24 = scalar_lea.vmem %s1613_s2, %s1106_s20  ;;  %s1322_s23 = smov 64  }
  0x18   : > { %1179 = vmatpush3.bf16.msra.mxu0 %v1261_v5  ;;  %v498_v16 = vsel %vm1449_vm4, %v470_v11, 0.0  ;;  %v497_v19 = vsel %vm1459_vm5, %v469_v18, 0.0  ;;  %vm1478_vm9 = vmand %vm484_vm6, %vm487_vm7  ;;  %v471_v27 = vld [vmem:[%s456_s24] sm:$0xff]  ;;  %v1266_v18 = vld [vmem:[%s1614_s3 + $0x50] sm:$0xff]   ;;  %s467_s27 = scalar_lea.vmem %s1620_s9, %s1431_s28 }
  0x19   : > { %1180 = vmatprep.subr.bf16.mxu0 %v1262_v10  ;;  %v501_v17 = vrot.slane %v498_v16, 7  ;;  %v500_v21 = vrot.slane %v497_v19, 7  ;;  %v509_v22 = vpack.c.bf16 %v498_v16, %v497_v19  ;;  %v511_v23 = vrot.slane %v497_v19, 1  ;;  %v1267_v19 = vld [vmem:[%s1614_s3 + $0x48] sm:$0xff]  }
  0x1a   : > { %v512_v24 = vrot.slane %v498_v16, 1  ;;  %v499_v28 = vsel %vm1478_vm9, %v471_v27, 0.0 }
  0x1b   : > { %522 = vrot.lane.b32.xlu0 %v509_v22, %s1321_s21  ;;  %v505_v26 = vsel %vm503_vm8, %v500_v21, %v501_v17  ;;  %v502_v29 = vrot.slane %v499_v28, 7  ;;  %v513_v30 = vrot.slane %v499_v28, 1  ;;  %v510_v32 = vpack.c.bf16 %v499_v28, %v499_v28 }
  0x1c   : > { %1181 = vmatpush3.bf16.msra.mxu0 %v1262_v10  ;;  %v516_v31 = vsel %vm514_vm10, %v511_v23, %v512_v24 }
  0x1d   : > { %1182 = vmatprep.subr.bf16.mxu0 %v1263_v14  ;;  %v515_v33 = vsel %vm514_vm10, %v512_v24, %v513_v30  ;;  %v517_v34 = vsel %vm514_vm10, %v513_v30, %v511_v23  ;;  %v506_v35 = vsel %vm503_vm8, %v502_v29, %v500_v21  ;;  %v504_v36 = vsel %vm503_vm8, %v501_v17, %v502_v29  ;;  %v1265_v17 = vld [vmem:[%s1614_s3 + $0x58] sm:$0xff]  }
  0x1e   : > { %v518_v37 = vpack.c.bf16 %v515_v33, %v516_v31  ;;  %v507_v38 = vpack.c.bf16 %v505_v26, %v506_v35  ;;  %v519_v39 = vpack.c.bf16 %v517_v34, %v517_v34  ;;  %v508_v42 = vpack.c.bf16 %v504_v36, %v504_v36  ;;  %1190 = vmatprep.subr.bf16.mxu1 %v1265_v17  ;;  %v1269_v34 = vld [vmem:[%s1614_s3 + $0x38] sm:$0xff]   ;;  %v1120_v35 = vld [vmem:[%s1617_s6] ss:$0 sm:$0xff] }
  0x1f   : > { %524 = vrot.lane.b32.xlu0 %v510_v32, %s1321_s21  ;;  %1191 = vmatpush3.bf16.msra.mxu1 %v1265_v17  ;;  %v1119_v32 = vld [vmem:[%s1616_s5] ss:$0 sm:$0xff] }
  0x20   : > { %1183 = vmatpush3.bf16.msra.mxu0 %v1263_v14  ;;  %528 = vrot.lane.b32.xlu1 %v518_v37, %s1322_s23 }
  0x21   : > { %1184 = vmatprep.subr.bf16.mxu0 %v1264_v20  ;;  %1192 = vmatprep.subr.bf16.mxu1 %v1266_v18 }
  0x23   : > { %1193 = vmatpush3.bf16.msra.mxu1 %v1266_v18 }
  0x24   : > { %1185 = vmatpush3.bf16.msra.mxu0 %v1264_v20  ;;  %530 = vrot.lane.b32.xlu1 %v519_v39, %s1322_s23  ;;  %v1268_v20 = vld [vmem:[%s1614_s3 + $0x40] sm:$0xff]  }
  0x25   : > { %1194 = vmatprep.subr.bf16.mxu1 %v1267_v19 }
  0x27   : > { %1195 = vmatpush3.bf16.msra.mxu1 %v1267_v19 }
  0x28   : > { %1196 = vmatprep.subr.bf16.mxu1 %v1268_v20 }
  0x2b   : > { %1197 = vmatpush3.bf16.msra.mxu1 %v1268_v20 }
  0x2c   : > { %1198 = vmatprep.subr.bf16.mxu1 %v1269_v34 }
  0x2f   : > { %1199 = vmatpush3.bf16.msra.mxu1 %v1269_v34  ;;  %v1146_v34 = vld [vmem:[%s1617_s6 + $0x1] ss:$0 sm:$0xff] }
  0x8d   : > { %v523_v40 = vpop.permute.xlu0 %522 }
  0x8e   : > { %v535_v41 = vsel %vm532_vm11, %v507_v38, %v523_v40  ;;  %v1270_v38 = vld [vmem:[%s1614_s3 + $0x30] sm:$0xff]  }
  0x8f   : > { %1200 = vmatprep.subr.bf16.mxu1 %v1270_v38 }
  0x90   : > { %1201 = vmatpush3.bf16.msra.mxu1 %v1270_v38  ;;  %v1147_v38 = vld [vmem:[%s1619_s8] ss:$0 sm:$0xff] }
  0x91   : > { %v525_v43 = vpop.permute.xlu0 %524 }
  0x92   : > { %v529_v44 = vpop.permute.xlu1 %528  ;;  %v538_v46 = vsel %vm532_vm11, %v508_v42, %v525_v43 }
  0x93   : > { %v541_v45 = vsel %vm539_vm12, %v535_v41, %v529_v44 }
  0x94   : > { %1186 = vmatprep.mubr.msk.bf16.mxu0 %vm599_vm13, %v541_v45 }
  0x96   : > { %v531_v47 = vpop.permute.xlu1 %530 }
  0x97   : > { %v543_v48 = vsel %vm539_vm12, %v538_v46, %v531_v47 }
  0x98   : > { %1187 = vmatmul.mubr.msk.bf16.vlgmr.msra.gmra.mxu0 %vm599_vm13, %v543_v48 }
 0x158   : > { %v1188_v49 = vpop.f32.mrf.mxu0 }
 0x159   : > { %v647_v52 = vadd.f32 %v1188_v49, %v1110_v50 }
 0x15a   : > { %v638_v51 = vpop.f32.mrf.mxu0 }
 0x15b   : > { %v639_v53 = vadd.f32 %v1110_v50, %v638_v51  ;;  %v654_v57 = vmax.f32 %v647_v52, 0.0 }
 0x15c   : > { %v1189_v54 = vpop.f32.mrf.mxu0 }
 0x15d   : > { %v652_v55 = vmax.f32 %v639_v53, 0.0  ;;  %v661_v62 = vsel %vm532_vm11, %v654_v57, 0.0 }
 0x15e   : > { %v641_v56 = vpop.f32.mrf.mxu0 }
 0x15f   : > { %v642_v58 = vadd.f32 %v1110_v50, %v641_v56  ;;  %v655_v59 = vsel %vm532_vm11, %v652_v55, 0.0 }
 0x160   : > { %656 = vadd.xlane.f32.xlu0 %v655_v59 }
 0x161   : > { %v653_v60 = vmax.f32 %v642_v58, 0.0 }
 0x163   : > { %v658_v61 = vsel %vm532_vm11, %v653_v60, 0.0 }
 0x164   : > { %659 = vadd.xlane.f32.xlu1 %v658_v61  ;;  %662 = vadd.xlane.f32.xlu0 %v661_v62 }
 0x1e9   : > { %v657_v63 = vpop.xlane.xlu0 %656 }
 0x1ea   : > { %v665_v0 = vmul.f32 0.03125, %v657_v63 }
 0x1ec   : > { %v668_v1 = vsub.f32 %v652_v55, %v665_v0 }
 0x1ed   : > { %v660_v2 = vpop.xlane.xlu1 %659  ;;  %v663_v4 = vpop.xlane.xlu0 %662 }
 0x1ee   : > { %v666_v5 = vmul.f32 0.03125, %v660_v2  ;;  %v667_v6 = vmul.f32 0.03125, %v663_v4  ;;  %v671_v7 = vmul.f32 %v668_v1, %v668_v1 }
 0x1f0   : > { %v669_v8 = vsub.f32 %v653_v60, %v666_v5  ;;  %v670_v9 = vsub.f32 %v654_v57, %v667_v6  ;;  %v674_v10 = vsel %vm532_vm11, %v671_v7, 0.0 }
 0x1f1   : > { %675 = vadd.xlane.f32.xlu0 %v674_v10 }
 0x1f2   : > { %v672_v11 = vmul.f32 %v669_v8, %v669_v8  ;;  %v673_v12 = vmul.f32 %v670_v9, %v670_v9 }
 0x1f4   : > { %v677_v14 = vsel %vm532_vm11, %v672_v11, 0.0  ;;  %v680_v16 = vsel %vm532_vm11, %v673_v12, 0.0  ;;  %v1134_v12 = vld [vmem:[%s1615_s4 + $0x1] ss:$0 sm:$0xff] }
 0x1f5   : > { %678 = vadd.xlane.f32.xlu1 %v677_v14  ;;  %681 = vadd.xlane.f32.xlu0 %v680_v16 }
 0x27a   : > { %v676_v21 = vpop.xlane.xlu0 %675 }
 0x27b   : > { %v683_v22 = vmul.f32 0.03125, %v676_v21 }
 0x27d   : > { %v686_v23 = vadd.f32 1e-05, %v683_v22 }
 0x27e   : > { %v679_v24 = vpop.xlane.xlu1 %678  ;;  %v682_v26 = vpop.xlane.xlu0 %681 }
 0x27f   : > { %1273 = vrsqrt.f32 %v686_v23  ;;  %v684_v27 = vmul.f32 0.03125, %v679_v24  ;;  %v685_v28 = vmul.f32 0.03125, %v682_v26  ;;  %v1271_v24 = vld [vmem:[%s1618_s7 + $0x8] sm:$0xff]   ;;  %v1323_v26 = vmov 0.0  }
 0x280   : > { %1206 = vmatprep.subr.bf16.mxu0 %v1323_v26  ;;  %1210 = vmatprep.mubr.msk.bf16.mxu0 %vm1324_vm14, %v1323_v26 }
 0x281   : > { %v687_v29 = vadd.f32 1e-05, %v684_v27  ;;  %v688_v30 = vadd.f32 1e-05, %v685_v28  ;;  %1207 = vmatpush3.bf16.msra.mxu0 %v1271_v24  ;;  %v1272_v27 = vld [vmem:[%s1618_s7] sm:$0xff]  }
 0x282   : > { %1208 = vmatprep.subr.bf16.mxu0 %v1323_v26 }
 0x283   : > { %1275 = vrsqrt.f32 %v687_v29 }
 0x284   : > { %1277 = vrsqrt.f32 %v688_v30 }
 0x285   : > { %1209 = vmatpush3.bf16.msra.mxu0 %v1272_v27 }
 0x28c   : > { %v1274_v31 = vpop.eup %1273 }
 0x28d   : > { %v692_v33 = vmul.f32 %v1274_v31, %v668_v1 }
 0x28f   : > { %v702_v36 = vmul.f32 %v1119_v32, %v692_v33 }
 0x290   : > { %v1276_v37 = vpop.eup %1275 }
 0x291   : > { %v1278_v39 = vpop.eup %1277  ;;  %v693_v40 = vmul.f32 %v1276_v37, %v669_v8  ;;  %v712_v41 = vadd.f32 %v1120_v35, %v702_v36 }
 0x292   : > { %v694_v42 = vmul.f32 %v1278_v39, %v670_v9 }
 0x293   : > { %v703_v43 = vmul.f32 %v1119_v32, %v693_v40  ;;  %v715_v44 = vsel %vm1459_vm5, %v712_v41, 0.0 }
 0x294   : > { %v704_v45 = vmul.f32 %v1119_v32, %v694_v42  ;;  %v728_v49 = vrot.slane %v715_v44, 1  ;;  %v718_v50 = vrot.slane %v715_v44, 7  ;;  %v1144_v32 = vld [vmem:[%s1616_s5 + $0x1] ss:$0 sm:$0xff] }
 0x295   : > { %v713_v46 = vadd.f32 %v1120_v35, %v703_v43 }
 0x296   : > { %v714_v47 = vadd.f32 %v1120_v35, %v704_v45 }
 0x297   : > { %v716_v48 = vsel %vm1449_vm4, %v713_v46, 0.0 }
 0x298   : > { %v719_v51 = vrot.slane %v716_v48, 7  ;;  %v726_v52 = vpack.c.bf16 %v716_v48, %v715_v44  ;;  %v729_v53 = vrot.slane %v716_v48, 1  ;;  %v717_v54 = vsel %vm1478_vm9, %v714_v47, 0.0 }
 0x299   : > { %v727_v55 = vpack.c.bf16 %v717_v54, %v717_v54  ;;  %v730_v56 = vrot.slane %v717_v54, 1  ;;  %v720_v57 = vrot.slane %v717_v54, 7 }
 0x29a   : > { %738 = vrot.lane.b32.xlu1 %v726_v52, %s1321_s21  ;;  %v732_v15 = vsel %vm514_vm10, %v728_v49, %v729_v53  ;;  %v722_v13 = vsel %vm503_vm8, %v718_v50, %v719_v51 }
 0x29b   : > { %740 = vrot.lane.b32.xlu0 %v727_v55, %s1321_s21  ;;  %v731_v58 = vsel %vm514_vm10, %v729_v53, %v730_v56  ;;  %v723_v25 = vsel %vm503_vm8, %v720_v57, %v718_v50  ;;  %v721_v59 = vsel %vm503_vm8, %v719_v51, %v720_v57  ;;  %v733_v62 = vsel %vm514_vm10, %v730_v56, %v728_v49 }
 0x29c   : > { %v734_v60 = vpack.c.bf16 %v731_v58, %v732_v15  ;;  %v724_v61 = vpack.c.bf16 %v722_v13, %v723_v25  ;;  %v735_v63 = vpack.c.bf16 %v733_v62, %v733_v62  ;;  %v725_v6 = vpack.c.bf16 %v721_v59, %v721_v59 }
 0x29e   : > { %744 = vrot.lane.b32.xlu1 %v734_v60, %s1322_s23 }
 0x2a2   : > { %746 = vrot.lane.b32.xlu1 %v735_v63, %s1322_s23 }
 0x30c   : > { %v739_v0 = vpop.permute.xlu1 %738 }
 0x30d   : > { %v750_v1 = vsel %vm532_vm11, %v724_v61, %v739_v0  ;;  %v741_v4 = vpop.permute.xlu0 %740 }
 0x30e   : > { %v753_v7 = vsel %vm532_vm11, %v725_v6, %v741_v4 }
 0x310   : > { %v745_v2 = vpop.permute.xlu1 %744 }
 0x311   : > { %v755_v5 = vsel %vm539_vm12, %v750_v1, %v745_v2 }
 0x312   : > { %1202 = vmatprep.mubr.msk.bf16.mxu1 %vm599_vm13, %v755_v5 }
 0x314   : > { %v747_v8 = vpop.permute.xlu1 %746 }
 0x315   : > { %v757_v3 = vsel %vm539_vm12, %v753_v7, %v747_v8 }
 0x316   : > { %1203 = vmatmul.mubr.msk.bf16.vlgmr.msra.gmra.mxu1 %vm599_vm13, %v757_v3 }
 0x3d6   : > { %v1204_v9 = vpop.f32.mrf.mxu1 }
 0x3d8   : > { %v853_v10 = vpop.f32.mrf.mxu1 }
 0x3da   : > { %v1205_v11 = vpop.f32.mrf.mxu1 }
 0x3dc   : > { %v855_v14 = vpop.f32.mrf.mxu1 }
 0x3dd   : > { %v856_v16 = vadd.f32 %v1134_v12, %v855_v14 }
 0x3df   : > { %v865_v17 = vmax.f32 %v856_v16, 0.0 }
 0x3e1   : > { %v866_v18 = vsel %vm532_vm11, %v865_v17, 0.0 }
 0x3e2   : > { %867 = vadd.xlane.f32.xlu0 %v866_v18 }
 0x46b   : > { %v868_v19 = vpop.xlane.xlu0 %867 }
 0x46c   : > { %v869_v20 = vmul.f32 0.03125, %v868_v19 }
 0x46e   : > { %v870_v21 = vsub.f32 %v865_v17, %v869_v20 }
 0x470   : > { %v871_v22 = vmul.f32 %v870_v21, %v870_v21 }
 0x472   : > { %v872_v23 = vsel %vm532_vm11, %v871_v22, 0.0 }
 0x473   : > { %873 = vadd.xlane.f32.xlu1 %v872_v23 }
 0x4fc   : > { %v874_v28 = vpop.xlane.xlu1 %873 }
 0x4fd   : > { %v875_v29 = vmul.f32 0.03125, %v874_v28 }
 0x4ff   : > { %v876_v30 = vadd.f32 1e-05, %v875_v29 }
 0x501   : > { %1279 = vrsqrt.f32 %v876_v30 }
 0x50e   : > { %v1280_v31 = vpop.eup %1279 }
 0x50f   : > { %v878_v33 = vmul.f32 %v1280_v31, %v870_v21 }
 0x511   : > { %v887_v35 = vmul.f32 %v1144_v32, %v878_v33 }
 0x513   : > { %v896_v36 = vadd.f32 %v1146_v34, %v887_v35 }
 0x515   : > { %v897_v37 = vpack.c.bf16 %v896_v36, %v896_v36 }
 0x517   : > { %1211 = vmatmul.mubr.msk.bf16.vlgmr.msra.gmra.mxu0 %vm532_vm11, %v897_v37 }
 0x5d7   : > { %v958_v39 = vpop.f32.mrf.mxu0 }
 0x5d8   : > { %v959_v40 = vadd.f32 %v1147_v38, %v958_v39 }
 0x5d9   : > { %v1212_v41 = vpop.f32.mrf.mxu0 }
 0x5da   : > { %965 = vst.msk [vmem:[%s467_s27] sm:$0xff] %vm964_vm15, %v959_v40 }
 0x5db   : > { %v961_v42 = vpop.f32.mrf.mxu0 }
 0x5dd   : > { %v1213_v43 = vpop.f32.mrf.mxu0 }
 0x5de PF: > { %s19_s13 = sadd.s32 1, %s1319_s13   ;;  %s1628_s30 = smov %s1311_s11 }
 0x5df   : > { %p16_p10 = scmp.ge.s32.totalorder %s19_s13, 8   ;;  %s1629_s10 = smov %s1315_s12 }
 0x5e0   : > { %s1630_s11 = smov %s1633_s14  ;;  %s1631_s12 = smov %s1637_s15 }
 0x5e1   :  { %18 = sbr.rel (!%p16_p10) target bundleno = 3 (0x3), region = 96 }

// kernel: tpu_custom_call.1
= control target key start
LH: loop header
LB: loop body
LE: loop exit
PB: predicated region body
PF: predicated region fallthrough
CT: control target
= control target key end

     0   :  { %s1375_s30 = smov 0   ;;  %s1377_s10 = smov 0   ;;  %s1611_s0 = inlined_call_operand.vmem [shape: f32[2,24,32], index: 0, kind: input, shape index: {}]   ;;  %s1612_s1 = inlined_call_operand.vmem [shape: f32[2,24,32], index: 1, kind: input, shape index: {}]   ;;  %s1613_s2 = inlined_call_operand.vmem [shape: f32[2,24,32], index: 2, kind: input, shape index: {}]   ;;  %s1614_s3 = inlined_call_operand.vmem [shape: bf16[2,96,32], index: 3, kind: input, shape index: {}]   ;;  %s1615_s4 = inlined_call_operand.vmem [shape: f32[2,1,32], index: 4, kind: input, shape index: {}]   ;;  %s1616_s5 = inlined_call_operand.vmem [shape: f32[2,1,32], index: 5, kind: input, shape index: {}]   ;;  %s1617_s6 = inlined_call_operand.vmem [shape: f32[2,1,32], index: 6, kind: input, shape index: {}]   ;;  %s1618_s7 = inlined_call_operand.vmem [shape: bf16[32,8], index: 7, kind: input, shape index: {}]   ;;  %s1619_s8 = inlined_call_operand.vmem [shape: f32[1,8], index: 8, kind: input, shape index: {}]   ;;  %s1620_s9 = inlined_call_operand.vmem [shape: f32[2,24,8], index: 9, kind: output, shape index: {}]  }
   0x1   :  { %s1379_s11 = smov 0   ;;  %s1381_s12 = smov 0  }
   0x2   :  { %s1383_s13 = smov 0  }
   0x3 LB: > { %s28_s14 = sadd.s32 1, %s1311_s11  ;;  %s31_s15 = sadd.s32 1, %s1315_s12  ;;  %s1319_s13 = sphi %s1383_s13, %s19_s13   ;;  %s1315_s12 = sphi %s1381_s12, %s1631_s12   ;;  %s1311_s11 = sphi %s1379_s11, %s1630_s11   ;;  %s1307_s10 = sphi %s1377_s10, %s1629_s10   ;;  %s1303_s30 = sphi %s1375_s30, %s1628_s30  }
   0x4   : > { %p29_p0 = scmp.ge.s32.totalorder %s28_s14, 3  ;;  %p1094_p1 = scmp.ge.s32.totalorder %s1319_s13, 1 }
   0x5   : > { %p360_p2 = scmp.lt.s32.totalorder %s1319_s13, 7 }
   0x6   : > { %s1633_s14 = smov (%p29_p0, %s28_s14), 0  ;;  %s1635_s15 = smov (!%p29_p0, %s31_s15), %s1315_s12 }
   0x7   : > { %p361_p3 = pnand %p1094_p1, %p360_p2  ;;  %p33_p4 = scmp.ge.s32.totalorder %s1635_s15, 2 }
   0x8   : > { %p424_p5 = scmp.lt.s32.totalorder (!%p361_p3), %s1307_s10, 1  ;;  %p426_p6 = scmp.lt.s32.totalorder (!%p361_p3), %s1303_s30, 2 }
   0x9   : > { %s1637_s15 = smov (%p33_p4, %s1635_s15), 0  ;;  %364 = sbr.rel (%p361_p3) target bundleno = 1502 (0x5de), region = 56 }
   0xa   : > { %s1409_s16 = sadd.s32 (!%p361_p3), 4294967295, %s1303_s30  ;;  %s1108_s17 = sshll.u32 (!%p361_p3), %s1303_s30, 3 }
   0xb   : > { %p433_p7 = scmp.gt.s32.totalorder (!%p361_p3), %s1409_s16, 0  ;;  %s1109_s26 = sadd.s32 (!%p361_p3), 4294967288, %s1108_s17 }
   0xc   : > { %p1097_p8 = scmp.lt.s32.totalorder (!%p361_p3), %s1409_s16, 2  ;;  %s446_s29 = sadd.s32 (!%p361_p3), 1, %s1303_s30 }
   0xd   : > { %p1443_p9 = scmp.lt.s32.totalorder (!%p361_p3), %s446_s29, 2  ;;  %s1321_s21 = smov (!%p361_p3), 32  }
   0xe   : > { %v472_v0 = vlaneseq  ;;  %v1259_v1 = vld [vmem:[%s1614_s3 + $0x28] sm:$0xff]   ;;  %v1260_v2 = vld [vmem:[%s1614_s3 + $0x20] sm:$0xff]   ;;  %s1639_s10 = smov (!%p424_p5, %s1307_s10), 1  ;;  %v1261_v5 = vld [vmem:[%s1614_s3 + $0x18] sm:$0xff]   ;;  %v478_v7 = vstv %s1109_s26  ;;  %vm532_vm11 = vcmask 261120   ;;  %vm539_vm12 = vcmask 523264  }
   0xf   : > { %s427_s22 = scalar_select %p426_p6, %s1303_s30, 2  ;;  %1174 = vmatprep.subr.bf16.mxu0 %v1259_v1  ;;  %v1262_v10 = vld [vmem:[%s1614_s3 + $0x10] sm:$0xff]   ;;  %v1263_v14 = vld [vmem:[%s1614_s3 + $0x8] sm:$0xff]   ;;  %v1264_v20 = vld [vmem:[%s1614_s3] sm:$0xff]   ;;  %vm599_vm13 = vcmask 785408   ;;  %vm1324_vm14 = vmmov 0  }
  0x10   : > { %v1418_v3 = vshrl.u32 %v472_v0, 7  ;;  %s1421_s23 = smul.u32 3, %s1639_s10  ;;  %1175 = vmatpush3.bf16.msra.mxu0 %v1259_v1  ;;  %s1643_s29 = smov (!%p1443_p9, %s446_s29), 2  ;;  %v1110_v50 = vld [vmem:[%s1615_s4] ss:$0 sm:$0xff]  ;;  %vm964_vm15 = vcmask 64512  }
  0x11   : > { %1176 = vmatprep.subr.bf16.mxu0 %v1260_v2  ;;  %s434_s17 = scalar_select %p433_p7, %s1409_s16, 0 }
  0x12   : > { %v474_v4 = vadd.s32 8, %v1418_v3  ;;  %s429_s27 = sadd.s32 %s1421_s23, %s427_s22  ;;  %v475_v6 = vadd.s32 16, %v1418_v3  ;;  %v479_v8 = vadd.s32 %v478_v7, %v1418_v3  ;;  %s1645_s29 = smov (!%p1443_p9, %s1643_s29), 2  ;;  %vm503_vm8 = vcmp.lt.s32.totalorder %v1418_v3, 1 }
  0x13   : > { %s1431_s28 = sshll.u32 %s429_s27, 3  ;;  %s1641_s17 = smov (!%p1097_p8, %s434_s17), 2  ;;  %vm514_vm10 = vcmp.lt.s32.totalorder %v1418_v3, 7 }
  0x14   : > { %v480_v9 = vadd.s32 %v478_v7, %v474_v4  ;;  %s431_s19 = scalar_lea.vmem %s1611_s0, %s1431_s28  ;;  %1177 = vmatpush3.bf16.msra.mxu0 %v1260_v2  ;;  %v481_v12 = vadd.s32 %v478_v7, %v475_v6  ;;  %vm482_vm2 = vcmp.ge.s32.totalorder %v479_v8, 0  ;;  %vm485_vm3 = vcmp.lt.s32.totalorder %v479_v8, 24  ;;  %s440_s30 = sadd.s32 %s1421_s23, %s1641_s17 }
  0x15   : > { %1178 = vmatprep.subr.bf16.mxu0 %v1261_v5  ;;  %v470_v11 = vld [vmem:[%s431_s19] sm:$0xff]  ;;  %s1102_s26 = sshll.u32 %s440_s30, 3  ;;  %vm1459_vm5 = vmand %vm482_vm2, %vm485_vm3  ;;  %s454_s17 = sadd.s32 %s1421_s23, %s1645_s29 }
  0x16   : > { %vm483_vm0 = vcmp.ge.s32.totalorder %v480_v9, 0  ;;  %vm486_vm1 = vcmp.lt.s32.totalorder %v480_v9, 24  ;;  %vm484_vm6 = vcmp.ge.s32.totalorder %v481_v12, 0  ;;  %s442_s10 = scalar_lea.vmem %s1612_s1, %s1102_s26  ;;  %vm487_vm7 = vcmp.lt.s32.totalorder %v481_v12, 24  ;;  %s1106_s20 = sshll.u32 %s454_s17, 3 }
  0x17   : > { %vm1449_vm4 = vmand %vm483_vm0, %vm486_vm1  ;;  %v469_v18 = vld [vmem:[%s442_s10] sm:$0xff]  ;;  %s456_s24 = scalar_lea.vmem %s1613_s2, %s1106_s20  ;;  %s1322_s23 = smov 64  }
  0x18   : > { %1179 = vmatpush3.bf16.msra.mxu0 %v1261_v5  ;;  %v498_v16 = vsel %vm1449_vm4, %v470_v11, 0.0  ;;  %v497_v19 = vsel %vm1459_vm5, %v469_v18, 0.0  ;;  %vm1478_vm9 = vmand %vm484_vm6, %vm487_vm7  ;;  %v471_v27 = vld [vmem:[%s456_s24] sm:$0xff]  ;;  %v1266_v18 = vld [vmem:[%s1614_s3 + $0x50] sm:$0xff]   ;;  %s467_s27 = scalar_lea.vmem %s1620_s9, %s1431_s28 }
  0x19   : > { %1180 = vmatprep.subr.bf16.mxu0 %v1262_v10  ;;  %v501_v17 = vrot.slane %v498_v16, 7  ;;  %v500_v21 = vrot.slane %v497_v19, 7  ;;  %v509_v22 = vpack.c.bf16 %v498_v16, %v497_v19  ;;  %v511_v23 = vrot.slane %v497_v19, 1  ;;  %v1267_v19 = vld [vmem:[%s1614_s3 + $0x48] sm:$0xff]  }
  0x1a   : > { %v512_v24 = vrot.slane %v498_v16, 1  ;;  %v499_v28 = vsel %vm1478_vm9, %v471_v27, 0.0 }
  0x1b   : > { %522 = vrot.lane.b32.xlu0 %v509_v22, %s1321_s21  ;;  %v505_v26 = vsel %vm503_vm8, %v500_v21, %v501_v17  ;;  %v502_v29 = vrot.slane %v499_v28, 7  ;;  %v513_v30 = vrot.slane %v499_v28, 1  ;;  %v510_v32 = vpack.c.bf16 %v499_v28, %v499_v28 }
  0x1c   : > { %1181 = vmatpush3.bf16.msra.mxu0 %v1262_v10  ;;  %v516_v31 = vsel %vm514_vm10, %v511_v23, %v512_v24 }
  0x1d   : > { %1182 = vmatprep.subr.bf16.mxu0 %v1263_v14  ;;  %v515_v33 = vsel %vm514_vm10, %v512_v24, %v513_v30  ;;  %v517_v34 = vsel %vm514_vm10, %v513_v30, %v511_v23  ;;  %v506_v35 = vsel %vm503_vm8, %v502_v29, %v500_v21  ;;  %v504_v36 = vsel %vm503_vm8, %v501_v17, %v502_v29  ;;  %v1265_v17 = vld [vmem:[%s1614_s3 + $0x58] sm:$0xff]  }
  0x1e   : > { %v518_v37 = vpack.c.bf16 %v515_v33, %v516_v31  ;;  %v507_v38 = vpack.c.bf16 %v505_v26, %v506_v35  ;;  %v519_v39 = vpack.c.bf16 %v517_v34, %v517_v34  ;;  %v508_v42 = vpack.c.bf16 %v504_v36, %v504_v36  ;;  %1190 = vmatprep.subr.bf16.mxu1 %v1265_v17  ;;  %v1269_v34 = vld [vmem:[%s1614_s3 + $0x38] sm:$0xff]   ;;  %v1120_v35 = vld [vmem:[%s1617_s6] ss:$0 sm:$0xff] }
  0x1f   : > { %524 = vrot.lane.b32.xlu0 %v510_v32, %s1321_s21  ;;  %1191 = vmatpush3.bf16.msra.mxu1 %v1265_v17  ;;  %v1119_v32 = vld [vmem:[%s1616_s5] ss:$0 sm:$0xff] }
  0x20   : > { %1183 = vmatpush3.bf16.msra.mxu0 %v1263_v14  ;;  %528 = vrot.lane.b32.xlu1 %v518_v37, %s1322_s23 }
  0x21   : > { %1184 = vmatprep.subr.bf16.mxu0 %v1264_v20  ;;  %1192 = vmatprep.subr.bf16.mxu1 %v1266_v18 }
  0x23   : > { %1193 = vmatpush3.bf16.msra.mxu1 %v1266_v18 }
  0x24   : > { %1185 = vmatpush3.bf16.msra.mxu0 %v1264_v20  ;;  %530 = vrot.lane.b32.xlu1 %v519_v39, %s1322_s23  ;;  %v1268_v20 = vld [vmem:[%s1614_s3 + $0x40] sm:$0xff]  }
  0x25   : > { %1194 = vmatprep.subr.bf16.mxu1 %v1267_v19 }
  0x27   : > { %1195 = vmatpush3.bf16.msra.mxu1 %v1267_v19 }
  0x28   : > { %1196 = vmatprep.subr.bf16.mxu1 %v1268_v20 }
  0x2b   : > { %1197 = vmatpush3.bf16.msra.mxu1 %v1268_v20 }
  0x2c   : > { %1198 = vmatprep.subr.bf16.mxu1 %v1269_v34 }
  0x2f   : > { %1199 = vmatpush3.bf16.msra.mxu1 %v1269_v34  ;;  %v1146_v34 = vld [vmem:[%s1617_s6 + $0x1] ss:$0 sm:$0xff] }
  0x8d   : > { %v523_v40 = vpop.permute.xlu0 %522 }
  0x8e   : > { %v535_v41 = vsel %vm532_vm11, %v507_v38, %v523_v40  ;;  %v1270_v38 = vld [vmem:[%s1614_s3 + $0x30] sm:$0xff]  }
  0x8f   : > { %1200 = vmatprep.subr.bf16.mxu1 %v1270_v38 }
  0x90   : > { %1201 = vmatpush3.bf16.msra.mxu1 %v1270_v38  ;;  %v1147_v38 = vld [vmem:[%s1619_s8] ss:$0 sm:$0xff] }
  0x91   : > { %v525_v43 = vpop.permute.xlu0 %524 }
  0x92   : > { %v529_v44 = vpop.permute.xlu1 %528  ;;  %v538_v46 = vsel %vm532_vm11, %v508_v42, %v525_v43 }
  0x93   : > { %v541_v45 = vsel %vm539_vm12, %v535_v41, %v529_v44 }
  0x94   : > { %1186 = vmatprep.mubr.msk.bf16.mxu0 %vm599_vm13, %v541_v45 }
  0x96   : > { %v531_v47 = vpop.permute.xlu1 %530 }
  0x97   : > { %v543_v48 = vsel %vm539_vm12, %v538_v46, %v531_v47 }
  0x98   : > { %1187 = vmatmul.mubr.msk.bf16.vlgmr.msra.gmra.mxu0 %vm599_vm13, %v543_v48 }
 0x158   : > { %v1188_v49 = vpop.f32.mrf.mxu0 }
 0x159   : > { %v647_v52 = vadd.f32 %v1188_v49, %v1110_v50 }
 0x15a   : > { %v638_v51 = vpop.f32.mrf.mxu0 }
 0x15b   : > { %v639_v53 = vadd.f32 %v1110_v50, %v638_v51  ;;  %v654_v57 = vmax.f32 %v647_v52, 0.0 }
 0x15c   : > { %v1189_v54 = vpop.f32.mrf.mxu0 }
 0x15d   : > { %v652_v55 = vmax.f32 %v639_v53, 0.0  ;;  %v661_v62 = vsel %vm532_vm11, %v654_v57, 0.0 }
 0x15e   : > { %v641_v56 = vpop.f32.mrf.mxu0 }
 0x15f   : > { %v642_v58 = vadd.f32 %v1110_v50, %v641_v56  ;;  %v655_v59 = vsel %vm532_vm11, %v652_v55, 0.0 }
 0x160   : > { %656 = vadd.xlane.f32.xlu0 %v655_v59 }
 0x161   : > { %v653_v60 = vmax.f32 %v642_v58, 0.0 }
 0x163   : > { %v658_v61 = vsel %vm532_vm11, %v653_v60, 0.0 }
 0x164   : > { %659 = vadd.xlane.f32.xlu1 %v658_v61  ;;  %662 = vadd.xlane.f32.xlu0 %v661_v62 }
 0x1e9   : > { %v657_v63 = vpop.xlane.xlu0 %656 }
 0x1ea   : > { %v665_v0 = vmul.f32 0.03125, %v657_v63 }
 0x1ec   : > { %v668_v1 = vsub.f32 %v652_v55, %v665_v0 }
 0x1ed   : > { %v660_v2 = vpop.xlane.xlu1 %659  ;;  %v663_v4 = vpop.xlane.xlu0 %662 }
 0x1ee   : > { %v666_v5 = vmul.f32 0.03125, %v660_v2  ;;  %v667_v6 = vmul.f32 0.03125, %v663_v4  ;;  %v671_v7 = vmul.f32 %v668_v1, %v668_v1 }
 0x1f0   : > { %v669_v8 = vsub.f32 %v653_v60, %v666_v5  ;;  %v670_v9 = vsub.f32 %v654_v57, %v667_v6  ;;  %v674_v10 = vsel %vm532_vm11, %v671_v7, 0.0 }
 0x1f1   : > { %675 = vadd.xlane.f32.xlu0 %v674_v10 }
 0x1f2   : > { %v672_v11 = vmul.f32 %v669_v8, %v669_v8  ;;  %v673_v12 = vmul.f32 %v670_v9, %v670_v9 }
 0x1f4   : > { %v677_v14 = vsel %vm532_vm11, %v672_v11, 0.0  ;;  %v680_v16 = vsel %vm532_vm11, %v673_v12, 0.0  ;;  %v1134_v12 = vld [vmem:[%s1615_s4 + $0x1] ss:$0 sm:$0xff] }
 0x1f5   : > { %678 = vadd.xlane.f32.xlu1 %v677_v14  ;;  %681 = vadd.xlane.f32.xlu0 %v680_v16 }
 0x27a   : > { %v676_v21 = vpop.xlane.xlu0 %675 }
 0x27b   : > { %v683_v22 = vmul.f32 0.03125, %v676_v21 }
 0x27d   : > { %v686_v23 = vadd.f32 1e-05, %v683_v22 }
 0x27e   : > { %v679_v24 = vpop.xlane.xlu1 %678  ;;  %v682_v26 = vpop.xlane.xlu0 %681 }
 0x27f   : > { %1273 = vrsqrt.f32 %v686_v23  ;;  %v684_v27 = vmul.f32 0.03125, %v679_v24  ;;  %v685_v28 = vmul.f32 0.03125, %v682_v26  ;;  %v1271_v24 = vld [vmem:[%s1618_s7 + $0x8] sm:$0xff]   ;;  %v1323_v26 = vmov 0.0  }
 0x280   : > { %1206 = vmatprep.subr.bf16.mxu0 %v1323_v26  ;;  %1210 = vmatprep.mubr.msk.bf16.mxu0 %vm1324_vm14, %v1323_v26 }
 0x281   : > { %v687_v29 = vadd.f32 1e-05, %v684_v27  ;;  %v688_v30 = vadd.f32 1e-05, %v685_v28  ;;  %1207 = vmatpush3.bf16.msra.mxu0 %v1271_v24  ;;  %v1272_v27 = vld [vmem:[%s1618_s7] sm:$0xff]  }
 0x282   : > { %1208 = vmatprep.subr.bf16.mxu0 %v1323_v26 }
 0x283   : > { %1275 = vrsqrt.f32 %v687_v29 }
 0x284   : > { %1277 = vrsqrt.f32 %v688_v30 }
 0x285   : > { %1209 = vmatpush3.bf16.msra.mxu0 %v1272_v27 }
 0x28c   : > { %v1274_v31 = vpop.eup %1273 }
 0x28d   : > { %v692_v33 = vmul.f32 %v1274_v31, %v668_v1 }
 0x28f   : > { %v702_v36 = vmul.f32 %v1119_v32, %v692_v33 }
 0x290   : > { %v1276_v37 = vpop.eup %1275 }
 0x291   : > { %v1278_v39 = vpop.eup %1277  ;;  %v693_v40 = vmul.f32 %v1276_v37, %v669_v8  ;;  %v712_v41 = vadd.f32 %v1120_v35, %v702_v36 }
 0x292   : > { %v694_v42 = vmul.f32 %v1278_v39, %v670_v9 }
 0x293   : > { %v703_v43 = vmul.f32 %v1119_v32, %v693_v40  ;;  %v715_v44 = vsel %vm1459_vm5, %v712_v41, 0.0 }
 0x294   : > { %v704_v45 = vmul.f32 %v1119_v32, %v694_v42  ;;  %v728_v49 = vrot.slane %v715_v44, 1  ;;  %v718_v50 = vrot.slane %v715_v44, 7  ;;  %v1144_v32 = vld [vmem:[%s1616_s5 + $0x1] ss:$0 sm:$0xff] }
 0x295   : > { %v713_v46 = vadd.f32 %v1120_v35, %v703_v43 }
 0x296   : > { %v714_v47 = vadd.f32 %v1120_v35, %v704_v45 }
 0x297   : > { %v716_v48 = vsel %vm1449_vm4, %v713_v46, 0.0 }
 0x298   : > { %v719_v51 = vrot.slane %v716_v48, 7  ;;  %v726_v52 = vpack.c.bf16 %v716_v48, %v715_v44  ;;  %v729_v53 = vrot.slane %v716_v48, 1  ;;  %v717_v54 = vsel %vm1478_vm9, %v714_v47, 0.0 }
 0x299   : > { %v727_v55 = vpack.c.bf16 %v717_v54, %v717_v54  ;;  %v730_v56 = vrot.slane %v717_v54, 1  ;;  %v720_v57 = vrot.slane %v717_v54, 7 }
 0x29a   : > { %738 = vrot.lane.b32.xlu1 %v726_v52, %s1321_s21  ;;  %v732_v15 = vsel %vm514_vm10, %v728_v49, %v729_v53  ;;  %v722_v13 = vsel %vm503_vm8, %v718_v50, %v719_v51 }
 0x29b   : > { %740 = vrot.lane.b32.xlu0 %v727_v55, %s1321_s21  ;;  %v731_v58 = vsel %vm514_vm10, %v729_v53, %v730_v56  ;;  %v723_v25 = vsel %vm503_vm8, %v720_v57, %v718_v50  ;;  %v721_v59 = vsel %vm503_vm8, %v719_v51, %v720_v57  ;;  %v733_v62 = vsel %vm514_vm10, %v730_v56, %v728_v49 }
 0x29c   : > { %v734_v60 = vpack.c.bf16 %v731_v58, %v732_v15  ;;  %v724_v61 = vpack.c.bf16 %v722_v13, %v723_v25  ;;  %v735_v63 = vpack.c.bf16 %v733_v62, %v733_v62  ;;  %v725_v6 = vpack.c.bf16 %v721_v59, %v721_v59 }
 0x29e   : > { %744 = vrot.lane.b32.xlu1 %v734_v60, %s1322_s23 }
 0x2a2   : > { %746 = vrot.lane.b32.xlu1 %v735_v63, %s1322_s23 }
 0x30c   : > { %v739_v0 = vpop.permute.xlu1 %738 }
 0x30d   : > { %v750_v1 = vsel %vm532_vm11, %v724_v61, %v739_v0  ;;  %v741_v4 = vpop.permute.xlu0 %740 }
 0x30e   : > { %v753_v7 = vsel %vm532_vm11, %v725_v6, %v741_v4 }
 0x310   : > { %v745_v2 = vpop.permute.xlu1 %744 }
 0x311   : > { %v755_v5 = vsel %vm539_vm12, %v750_v1, %v745_v2 }
 0x312   : > { %1202 = vmatprep.mubr.msk.bf16.mxu1 %vm599_vm13, %v755_v5 }
 0x314   : > { %v747_v8 = vpop.permute.xlu1 %746 }
 0x315   : > { %v757_v3 = vsel %vm539_vm12, %v753_v7, %v747_v8 }
 0x316   : > { %1203 = vmatmul.mubr.msk.bf16.vlgmr.msra.gmra.mxu1 %vm599_vm13, %v757_v3 }
 0x3d6   : > { %v1204_v9 = vpop.f32.mrf.mxu1 }
 0x3d8   : > { %v853_v10 = vpop.f32.mrf.mxu1 }
 0x3da   : > { %v1205_v11 = vpop.f32.mrf.mxu1 }
 0x3dc   : > { %v855_v14 = vpop.f32.mrf.mxu1 }
 0x3dd   : > { %v856_v16 = vadd.f32 %v1134_v12, %v855_v14 }
 0x3df   : > { %v865_v17 = vmax.f32 %v856_v16, 0.0 }
 0x3e1   : > { %v866_v18 = vsel %vm532_vm11, %v865_v17, 0.0 }
 0x3e2   : > { %867 = vadd.xlane.f32.xlu0 %v866_v18 }
 0x46b   : > { %v868_v19 = vpop.xlane.xlu0 %867 }
 0x46c   : > { %v869_v20 = vmul.f32 0.03125, %v868_v19 }
 0x46e   : > { %v870_v21 = vsub.f32 %v865_v17, %v869_v20 }
 0x470   : > { %v871_v22 = vmul.f32 %v870_v21, %v870_v21 }
 0x472   : > { %v872_v23 = vsel %vm532_vm11, %v871_v22, 0.0 }
 0x473   : > { %873 = vadd.xlane.f32.xlu1 %v872_v23 }
 0x4fc   : > { %v874_v28 = vpop.xlane.xlu1 %873 }
 0x4fd   : > { %v875_v29 = vmul.f32 0.03125, %v874_v28 }
 0x4ff   : > { %v876_v30 = vadd.f32 1e-05, %v875_v29 }
 0x501   : > { %1279 = vrsqrt.f32 %v876_v30 }
 0x50e   : > { %v1280_v31 = vpop.eup %1279 }
 0x50f   : > { %v878_v33 = vmul.f32 %v1280_v31, %v870_v21 }
 0x511   : > { %v887_v35 = vmul.f32 %v1144_v32, %v878_v33 }
 0x513   : > { %v896_v36 = vadd.f32 %v1146_v34, %v887_v35 }
 0x515   : > { %v897_v37 = vpack.c.bf16 %v896_v36, %v896_v36 }
 0x517   : > { %1211 = vmatmul.mubr.msk.bf16.vlgmr.msra.gmra.mxu0 %vm532_vm11, %v897_v37 }
 0x5d7   : > { %v958_v39 = vpop.f32.mrf.mxu0 }
 0x5d8   : > { %v959_v40 = vadd.f32 %v1147_v38, %v958_v39 }
 0x5d9   : > { %v1212_v41 = vpop.f32.mrf.mxu0 }
 0x5da   : > { %965 = vst.msk [vmem:[%s467_s27] sm:$0xff] %vm964_vm15, %v959_v40 }
 0x5db   : > { %v961_v42 = vpop.f32.mrf.mxu0 }
 0x5dd   : > { %v1213_v43 = vpop.f32.mrf.mxu0 }
 0x5de PF: > { %s19_s13 = sadd.s32 1, %s1319_s13   ;;  %s1628_s30 = smov %s1311_s11 }
 0x5df   : > { %p16_p10 = scmp.ge.s32.totalorder %s19_s13, 8   ;;  %s1629_s10 = smov %s1315_s12 }
 0x5e0   : > { %s1630_s11 = smov %s1633_s14  ;;  %s1631_s12 = smov %s1637_s15 }
 0x5e1   :  { %18 = sbr.rel (!%p16_p10) target bundleno = 3 (0x3), region = 96 }

</bundles_post_ra>
